<compile_context>
chip_gen: v6e
topology: v6e:2x2x1
jax: 0.10.0
libtpu: 0.0.40
codegen_flags: <defaults>
</compile_context>

<pallas_src>
import functools

import jax
import jax.numpy as jnp
from jax import lax
from jax.experimental import pallas as pl
from jax.experimental.pallas import tpu as pltpu


def _pose_gate_fusion_kernel(
    x_p0_ref,       # (P, C)  bf16  padded plane 0 of this batch item (seed)
    x_p1_ref,       # (P, C)  bf16  padded plane 1 of this batch item (seed)
    x_new_ref,      # (P, C)  bf16  padded plane d+2 (the one new plane/step)
    attn_ref,       # (L, 1)  f32   pose map in band layout (L = H*(W+2))
    w_rgb_ref,      # (3, 9*C, C) bf16  rgb_conv weight, rows (kd)(kh,kw,ci)
    b_rgb_ref,      # (1, C)  f32
    w_attn_ref,     # (1, C)  f32   attn_conv (1x1x1, 1 -> C)
    b_attn_ref,     # (1, C)  f32
    w_g1r_ref,      # (C, C)  bf16  gate conv1, rows acting on rgb_feat half
    w_attn_g1_ref,  # (1, C)  f32   folded w_attn @ w_g1a (attn half, rank-1)
    b_g1_ref,       # (1, C)  f32   gate conv1 bias + folded b_attn @ w_g1a
    w_g2_ref,       # (C, C)  bf16  gate conv2
    b_g2_ref,       # (1, C)  f32
    *outs,          # out_ref (L,C) f32 [, scale_ref (L,C) bf16], ring scratch
    H, W,
):
    if len(outs) == 3:
        out_ref, scale_ref, ring_ref = outs
    else:
        out_ref, ring_ref = outs
        scale_ref = None

    Wp = W + 2
    L = H * Wp
    d = pl.program_id(1)

    # --- depth-halo ring: padded plane p lives in ring slot p % 3 ------------
    @pl.when(d == 0)
    def _():                      # seed the trailing two planes of the window
        ring_ref[0] = x_p0_ref[...]
        ring_ref[1] = x_p1_ref[...]

    new_plane = x_new_ref[...]
    slot_new = (d + 2) % 3
    # static-indexed predicated stores (exactly one runs per step)
    @pl.when(slot_new == 0)
    def _(): ring_ref[0] = new_plane
    @pl.when(slot_new == 1)
    def _(): ring_ref[1] = new_plane
    @pl.when(slot_new == 2)
    def _(): ring_ref[2] = new_plane

    # --- rgb_conv: 3x3x3 / padding=1 as 3 per-kd GEMMs (K = 9*C) -------------
    # Band row i = h*Wp + w; tap (kh, kw) of plane kd is a *contiguous* row
    # slice starting at kh*Wp + kw -> no per-tap gather/relayout.
    rgb_feat = None
    for kd in range(3):
        plane = ring_ref[(d + kd) % 3]                       # (P, C) bf16
        pieces = [plane[kh * Wp + kw: kh * Wp + kw + L, :]
                  for kh in range(3) for kw in range(3)]
        patch = jnp.concatenate(pieces, axis=-1)             # (L, 9*C) bf16
        part = jnp.dot(patch, w_rgb_ref[kd],
                       preferred_element_type=jnp.float32)
        rgb_feat = part if rgb_feat is None else rgb_feat + part
    rgb_feat = rgb_feat + b_rgb_ref[...]                     # (L, C) f32

    # --- attn_conv: 1x1x1 from a single channel (rank-1 broadcast) -----------
    attn_col = attn_ref[...]                                  # (L, 1) f32
    attn_feat = attn_col * w_attn_ref[...] + b_attn_ref[...]  # (L, C) f32

    # --- gate = sigmoid(1x1(relu(1x1(cat[rgb, attn])))) -----------------------
    # attn half of conv1 folded into the exact rank-1 term attn_col*w_attn_g1.
    g1 = (jnp.dot(rgb_feat.astype(jnp.bfloat16), w_g1r_ref[...],
                  preferred_element_type=jnp.float32)
          + attn_col * w_attn_g1_ref[...]
          + b_g1_ref[...])
    g1 = jnp.maximum(g1, 0.0)
    gate = jax.nn.sigmoid(
        jnp.dot(g1.astype(jnp.bfloat16), w_g2_ref[...],
                preferred_element_type=jnp.float32) + b_g2_ref[...])

    # rgb*g + attn*(1-g) == attn + g*(rgb - attn)
    out_ref[...] = attn_feat + gate * (rgb_feat - attn_feat)
    if scale_ref is not None:
        scale_ref[...] = gate.astype(scale_ref.dtype)         # bf16 band


def _vmem_limit_bytes(P, L, C, with_scale):
    """Derive a vmem budget from the actual tile sizes, capped per-chip."""
    bf, f4 = 2, 4
    est = (3 * 2 * P * C * bf            # three (P,C) plane operands, 2 buffers
           + 3 * P * C * bf              # halo ring scratch
           + 2 * L * 128 * f4            # (L,1) attn block -> full 128-lane tile
           + 2 * (29 * C * C * bf + 8 * C * f4)   # resident weights (x2 bufs)
           + 2 * L * C * f4              # out band, double-buffered
           + (2 * L * C * bf if with_scale else 0)
           + L * 9 * C * bf + 4 * L * C * f4)     # patch + f32 temporaries
    try:
        cap = int(pltpu.get_tpu_info().vmem_capacity_bytes)
    except Exception:                    # pragma: no cover
        cap = 64 * 1024 * 1024           # v7x per-TC capacity (conservative)
    return max(32 * 1024 * 1024, min(2 * est + (4 << 20), (3 * cap) // 4))


def pose_gate_fusion_ndhwc(x_ndhwc, attn_ndhwc, p, with_scale=False):
    """x: (N, D, H, W, C) f32; attn: (N, D, H, W, 1) f32.
    Returns out (f32) and, if with_scale, the gate (last_scale)."""
    N, D, H, W, C = x_ndhwc.shape
    Wp = W + 2                       # padded width (band stride)
    P = (H + 3) * Wp                 # rows per padded plane (extra bottom row
                                     # keeps every tap's row slice in bounds)
    L = H * Wp                       # rows per output band (junk cols sliced)

    # pad + bf16 cast + flatten fuse into one XLA op.
    # TODO(synk): remove this extra HBM round trip via in-kernel boundary
    # gating + zero-filled VMEM band.
    xp = jnp.pad(x_ndhwc, ((0, 0), (1, 1), (1, 2), (1, 1), (0, 0)))
    xflat = xp.astype(jnp.bfloat16).reshape(N, D + 2, P, C)

    attn_band = jnp.pad(attn_ndhwc,
                        ((0, 0), (0, 0), (0, 0), (0, Wp - W), (0, 0)))
    attn_band = attn_band.reshape(N, D, L, 1).astype(jnp.float32)

    # rgb_conv weight as (3, 9C, C): per-kd blocks, rows ordered (kh, kw, ci)
    # to match the per-kd im2col column order in the kernel.
    w_rgb3 = p["w_rgb"].reshape(3, 9 * C, C).astype(jnp.bfloat16)
    w_g1r = p["w_g1r"].astype(jnp.bfloat16)
    w_g2 = p["w_g2"].astype(jnp.bfloat16)
    # attn half of gate-conv1 folded (attn_feat is rank-1 + bias => exact):
    w_attn_g1 = (p["w_attn"] @ p["w_g1a"]).astype(jnp.float32)     # (1, C)
    b_g1_eff = (p["b_g1"] + p["b_attn"] @ p["w_g1a"]).astype(jnp.float32)

    # seed planes 0/1 stay VMEM-resident per batch item; the third operand
    # streams exactly one new padded plane (index d+2) per grid step.
    plane_seed0 = pl.BlockSpec((None, None, P, C), lambda n, d: (n, 0, 0, 0))
    plane_seed1 = pl.BlockSpec((None, None, P, C), lambda n, d: (n, 1, 0, 0))
    plane_new = pl.BlockSpec((None, None, P, C), lambda n, d: (n, d + 2, 0, 0))

    def resident(shape):            # constant block index -> stays VMEM-resident
        return pl.BlockSpec(shape, lambda n, d: (0,) * len(shape))

    band_spec = pl.BlockSpec((None, None, L, C), lambda n, d: (n, d, 0, 0))

    if with_scale:
        out_shape = (jax.ShapeDtypeStruct((N, D, L, C), jnp.float32),
                     jax.ShapeDtypeStruct((N, D, L, C), jnp.bfloat16))
        out_specs = (band_spec, band_spec)
    else:
        out_shape = jax.ShapeDtypeStruct((N, D, L, C), jnp.float32)
        out_specs = band_spec

    kernel = functools.partial(_pose_gate_fusion_kernel, H=H, W=W)

    res = pl.pallas_call(
        kernel,
        grid=(N, D),
        in_specs=[
            plane_seed0, plane_seed1, plane_new,
            pl.BlockSpec((None, None, L, 1), lambda n, d: (n, d, 0, 0)),
            resident((3, 9 * C, C)), resident((1, C)),
            resident((1, C)), resident((1, C)),
            resident((C, C)), resident((1, C)), resident((1, C)),
            resident((C, C)), resident((1, C)),
        ],
        out_specs=out_specs,
        out_shape=out_shape,
        scratch_shapes=[pltpu.VMEM((3, P, C), jnp.bfloat16)],   # depth-halo ring
        compiler_params=pltpu.CompilerParams(
            # depth carries the halo ring -> sequential; batch splits across
            # TensorCores (keep N even/balanced for v7x megacore).
            dimension_semantics=("parallel", "arbitrary"),
            vmem_limit_bytes=_vmem_limit_bytes(P, L, C, with_scale),
        ),
    )(xflat, xflat, xflat, attn_band, w_rgb3, p["b_rgb"], p["w_attn"],
      p["b_attn"], w_g1r, w_attn_g1, b_g1_eff, w_g2, p["b_g2"])

    def unband(a):                   # drop the junk padded-W columns
        return a.reshape(N, D, H, Wp, C)[:, :, :, :W, :]

    if with_scale:
        out_band, scale_band = res
        return unband(out_band), unband(scale_band).astype(jnp.float32)
    return unband(res)


def pose_gate_fusion(x_ncdhw, attn_ncdhw, p, return_scale=False):
    """PyTorch-convention entry point: NCDHW in, NCDHW out.
    The module's `self.last_scale` is only materialized when return_scale."""
    x_ndhwc = jnp.transpose(x_ncdhw, (0, 2, 3, 4, 1))
    attn_ndhwc = jnp.transpose(attn_ncdhw, (0, 2, 3, 4, 1))
    if return_scale:
        out, scale = pose_gate_fusion_ndhwc(x_ndhwc, attn_ndhwc, p,
                                            with_scale=True)
        return (jnp.transpose(out, (0, 4, 1, 2, 3)),
                jnp.transpose(scale, (0, 4, 1, 2, 3)))
    out = pose_gate_fusion_ndhwc(x_ndhwc, attn_ndhwc, p, with_scale=False)
    return jnp.transpose(out, (0, 4, 1, 2, 3))


def init_params(key, C):
    # NOTE: real PyTorch weights need w_rgb permuted (Cout,Cin,kd,kh,kw) ->
    # (kd,kh,kw,Cin,Cout) and gate conv1's (Cout,2C) weight split/transposed
    # into w_g1r (rgb half) and w_g1a (attn half).
    ks = jax.random.split(key, 10)
    s = 0.1
    return {
        "w_rgb":  s * jax.random.normal(ks[0], (3, 3, 3, C, C), jnp.float32),
        "b_rgb":  s * jax.random.normal(ks[1], (1, C), jnp.float32),
        "w_attn": s * jax.random.normal(ks[2], (1, C), jnp.float32),
        "b_attn": s * jax.random.normal(ks[3], (1, C), jnp.float32),
        "w_g1r":  s * jax.random.normal(ks[4], (C, C), jnp.float32),
        "w_g1a":  s * jax.random.normal(ks[5], (C, C), jnp.float32),
        "b_g1":   s * jax.random.normal(ks[6], (1, C), jnp.float32),
        "w_g2":   s * jax.random.normal(ks[7], (C, C), jnp.float32),
        "b_g2":   s * jax.random.normal(ks[8], (1, C), jnp.float32),
    }


def reference_ndhwc(x_ndhwc, attn_ndhwc, p):
    """Pure-JAX f32 reference of the PyTorch forward; returns (out, gate)."""
    C = x_ndhwc.shape[-1]
    rgb = lax.conv_general_dilated(
        x_ndhwc, p["w_rgb"], window_strides=(1, 1, 1), padding="SAME",
        dimension_numbers=("NDHWC", "DHWIO", "NDHWC"),
    ) + p["b_rgb"].reshape(1, 1, 1, 1, C)
    att = attn_ndhwc * p["w_attn"].reshape(1, 1, 1, 1, C) \
        + p["b_attn"].reshape(1, 1, 1, 1, C)
    g1 = jnp.maximum(
        jnp.einsum("ndhwc,cf->ndhwf", rgb, p["w_g1r"])
        + jnp.einsum("ndhwc,cf->ndhwf", att, p["w_g1a"])
        + p["b_g1"].reshape(1, 1, 1, 1, C), 0.0)
    gate = jax.nn.sigmoid(
        jnp.einsum("ndhwc,cf->ndhwf", g1, p["w_g2"])
        + p["b_g2"].reshape(1, 1, 1, 1, C))
    return rgb * gate + att * (1.0 - gate), gate


if __name__ == "__main__":
    key = jax.random.PRNGKey(0)
    k_x, k_a, k_p = jax.random.split(key, 3)

    N, C, D, H, W = 2, 8, 4, 8, 8          # small NCDHW shapes
    x = jax.random.normal(k_x, (N, C, D, H, W), jnp.float32)
    attn = jax.random.normal(k_a, (N, 1, D, H, W), jnp.float32)
    params = init_params(k_p, C)

    # default forward: out only (no last_scale HBM traffic)
    fused = jax.jit(lambda xx, aa: pose_gate_fusion(xx, aa, params))
    out = jax.block_until_ready(fused(x, attn))

    # variant that also materializes the gate (module's last_scale, bf16 store)
    fused_s = jax.jit(
        lambda xx, aa: pose_gate_fusion(xx, aa, params, return_scale=True))
    out_s, scale = jax.block_until_ready(fused_s(x, attn))

    # pure-JAX f32 reference check (bf16 MXU inputs -> loosened tolerance)
    ref_out, ref_gate = reference_ndhwc(
        jnp.transpose(x, (0, 2, 3, 4, 1)),
        jnp.transpose(attn, (0, 2, 3, 4, 1)), params)
    ref_out = jnp.transpose(ref_out, (0, 4, 1, 2, 3))
    ref_gate = jnp.transpose(ref_gate, (0, 4, 1, 2, 3))

    assert out.shape == (N, C, D, H, W)
    assert jnp.allclose(out, ref_out, rtol=5e-2, atol=5e-2), "out mismatch"
    assert jnp.allclose(out_s, ref_out, rtol=5e-2, atol=5e-2), \
        "out (scale variant) mismatch"
    assert jnp.allclose(scale, ref_gate, rtol=5e-2, atol=5e-2), "gate mismatch"

    print("KERNEL_OK")
</pallas_src>

<mosaic_0001>
module attributes {stable_mosaic.version = 11 : i64} {
  func.func @_pose_gate_fusion_kernel(%arg0: i32, %arg1: i32, %arg2: memref<1x1x110x8xbf16, #tpu.memory_space<vmem>>, %arg3: memref<1x1x110x8xbf16, #tpu.memory_space<vmem>>, %arg4: memref<1x1x110x8xbf16, #tpu.memory_space<vmem>>, %arg5: memref<1x1x80x1xf32, #tpu.memory_space<vmem>>, %arg6: memref<3x72x8xbf16, #tpu.memory_space<vmem>>, %arg7: memref<1x8xf32, #tpu.memory_space<vmem>>, %arg8: memref<1x8xf32, #tpu.memory_space<vmem>>, %arg9: memref<1x8xf32, #tpu.memory_space<vmem>>, %arg10: memref<8x8xbf16, #tpu.memory_space<vmem>>, %arg11: memref<1x8xf32, #tpu.memory_space<vmem>>, %arg12: memref<1x8xf32, #tpu.memory_space<vmem>>, %arg13: memref<8x8xbf16, #tpu.memory_space<vmem>>, %arg14: memref<1x8xf32, #tpu.memory_space<vmem>>, %arg15: memref<1x1x80x8xf32, #tpu.memory_space<vmem>>, %arg16: memref<3x110x8xbf16, #tpu.memory_space<vmem>>) attributes {dimension_semantics = [#tpu.dimension_semantics<parallel>, #tpu.dimension_semantics<arbitrary>], iteration_bounds = array<i64: 2, 4>, scalar_prefetch = 0 : i64, scratch_operands = 1 : i64, tpu.core_type = #tpu.core_type<tc>, window_params = [{transform_indices = @transform_0, window_bounds = array<i64: 1, 1, 110, 8>}, {transform_indices = @transform_1, window_bounds = array<i64: 1, 1, 110, 8>}, {transform_indices = @transform_2, window_bounds = array<i64: 1, 1, 110, 8>}, {transform_indices = @transform_3, window_bounds = array<i64: 1, 1, 80, 1>}, {pipeline_mode = #tpu.pipeline_mode<synchronous>, transform_indices = @transform_4, window_bounds = array<i64: 3, 72, 8>}, {pipeline_mode = #tpu.pipeline_mode<synchronous>, transform_indices = @transform_5, window_bounds = array<i64: 1, 8>}, {pipeline_mode = #tpu.pipeline_mode<synchronous>, transform_indices = @transform_6, window_bounds = array<i64: 1, 8>}, {pipeline_mode = #tpu.pipeline_mode<synchronous>, transform_indices = @transform_7, window_bounds = array<i64: 1, 8>}, {pipeline_mode = #tpu.pipeline_mode<synchronous>, transform_indices = @transform_8, window_bounds = array<i64: 8, 8>}, {pipeline_mode = #tpu.pipeline_mode<synchronous>, transform_indices = @transform_9, window_bounds = array<i64: 1, 8>}, {pipeline_mode = #tpu.pipeline_mode<synchronous>, transform_indices = @transform_10, window_bounds = array<i64: 1, 8>}, {pipeline_mode = #tpu.pipeline_mode<synchronous>, transform_indices = @transform_11, window_bounds = array<i64: 8, 8>}, {pipeline_mode = #tpu.pipeline_mode<synchronous>, transform_indices = @transform_12, window_bounds = array<i64: 1, 8>}, {transform_indices = @transform_13, window_bounds = array<i64: 1, 1, 80, 8>}]} {
    %c0_i32 = arith.constant 0 : i32
    %0 = arith.cmpi eq, %arg1, %c0_i32 : i32
    %1 = arith.extui %0 : i1 to i32
    %c0_i32_0 = arith.constant 0 : i32
    %2 = arith.cmpi ne, %1, %c0_i32_0 : i32
    scf.if %2 {
      %c0_78 = arith.constant 0 : index
      %c0_79 = arith.constant 0 : index
      %c0_80 = arith.constant 0 : index
      %c0_81 = arith.constant 0 : index
      %150 = vector.load %arg2[%c0_78, %c0_79, %c0_80, %c0_81] : memref<1x1x110x8xbf16, #tpu.memory_space<vmem>>, vector<1x1x110x8xbf16>
      %151 = vector.shape_cast %150 : vector<1x1x110x8xbf16> to vector<110x8xbf16>
      %c0_82 = arith.constant 0 : index
      %c0_83 = arith.constant 0 : index
      %c0_84 = arith.constant 0 : index
      %152 = vector.load %arg16[%c0_82, %c0_83, %c0_84] : memref<3x110x8xbf16, #tpu.memory_space<vmem>>, vector<1x110x8xbf16>
      %153 = vector.shape_cast %152 : vector<1x110x8xbf16> to vector<110x8xbf16>
      %154 = vector.shape_cast %151 : vector<110x8xbf16> to vector<1x110x8xbf16>
      tpu.vector_store %arg16[%c0_82, %c0_83, %c0_84], %154 {strides = array<i32>} : memref<3x110x8xbf16, #tpu.memory_space<vmem>>, vector<1x110x8xbf16>,
      %c0_85 = arith.constant 0 : index
      %c0_86 = arith.constant 0 : index
      %c0_87 = arith.constant 0 : index
      %c0_88 = arith.constant 0 : index
      %155 = vector.load %arg3[%c0_85, %c0_86, %c0_87, %c0_88] : memref<1x1x110x8xbf16, #tpu.memory_space<vmem>>, vector<1x1x110x8xbf16>
      %156 = vector.shape_cast %155 : vector<1x1x110x8xbf16> to vector<110x8xbf16>
      %c1_89 = arith.constant 1 : index
      %c0_90 = arith.constant 0 : index
      %c0_91 = arith.constant 0 : index
      %157 = vector.load %arg16[%c1_89, %c0_90, %c0_91] : memref<3x110x8xbf16, #tpu.memory_space<vmem>>, vector<1x110x8xbf16>
      %158 = vector.shape_cast %157 : vector<1x110x8xbf16> to vector<110x8xbf16>
      %159 = vector.shape_cast %156 : vector<110x8xbf16> to vector<1x110x8xbf16>
      tpu.vector_store %arg16[%c1_89, %c0_90, %c0_91], %159 {strides = array<i32>} : memref<3x110x8xbf16, #tpu.memory_space<vmem>>, vector<1x110x8xbf16>,
    } else {
    }
    %c0 = arith.constant 0 : index
    %c0_1 = arith.constant 0 : index
    %c0_2 = arith.constant 0 : index
    %c0_3 = arith.constant 0 : index
    %3 = vector.load %arg4[%c0, %c0_1, %c0_2, %c0_3] : memref<1x1x110x8xbf16, #tpu.memory_space<vmem>>, vector<1x1x110x8xbf16>
    %4 = vector.shape_cast %3 : vector<1x1x110x8xbf16> to vector<110x8xbf16>
    %c2_i32 = arith.constant 2 : i32
    %5 = arith.addi %arg1, %c2_i32 : i32
    %c3_i32 = arith.constant 3 : i32
    %c0_i32_4 = arith.constant 0 : i32
    %6 = arith.cmpi eq, %c3_i32, %c0_i32_4 : i32
    %c1_i32 = arith.constant 1 : i32
    %7 = arith.select %6, %c1_i32, %c3_i32 : i32
    %8 = arith.remsi %5, %7 : i32
    %c0_i32_5 = arith.constant 0 : i32
    %9 = arith.cmpi ne, %8, %c0_i32_5 : i32
    %c0_i32_6 = arith.constant 0 : i32
    %10 = arith.cmpi slt, %8, %c0_i32_6 : i32
    %c0_i32_7 = arith.constant 0 : i32
    %11 = arith.cmpi slt, %7, %c0_i32_7 : i32
    %12 = arith.xori %10, %11 : i1
    %13 = arith.andi %12, %9 : i1
    %14 = arith.addi %8, %7 : i32
    %15 = arith.select %13, %14, %8 : i32
    %c0_i32_8 = arith.constant 0 : i32
    %16 = arith.cmpi eq, %15, %c0_i32_8 : i32
    %17 = arith.extui %16 : i1 to i32
    %c0_i32_9 = arith.constant 0 : i32
    %18 = arith.cmpi ne, %17, %c0_i32_9 : i32
    scf.if %18 {
      %c0_78 = arith.constant 0 : index
      %c0_79 = arith.constant 0 : index
      %c0_80 = arith.constant 0 : index
      %150 = vector.load %arg16[%c0_78, %c0_79, %c0_80] : memref<3x110x8xbf16, #tpu.memory_space<vmem>>, vector<1x110x8xbf16>
      %151 = vector.shape_cast %150 : vector<1x110x8xbf16> to vector<110x8xbf16>
      %152 = vector.shape_cast %4 : vector<110x8xbf16> to vector<1x110x8xbf16>
      tpu.vector_store %arg16[%c0_78, %c0_79, %c0_80], %152 {strides = array<i32>} : memref<3x110x8xbf16, #tpu.memory_space<vmem>>, vector<1x110x8xbf16>,
    } else {
    }
    %c1_i32_10 = arith.constant 1 : i32
    %19 = arith.cmpi eq, %15, %c1_i32_10 : i32
    %20 = arith.extui %19 : i1 to i32
    %c0_i32_11 = arith.constant 0 : i32
    %21 = arith.cmpi ne, %20, %c0_i32_11 : i32
    scf.if %21 {
      %c1_78 = arith.constant 1 : index
      %c0_79 = arith.constant 0 : index
      %c0_80 = arith.constant 0 : index
      %150 = vector.load %arg16[%c1_78, %c0_79, %c0_80] : memref<3x110x8xbf16, #tpu.memory_space<vmem>>, vector<1x110x8xbf16>
      %151 = vector.shape_cast %150 : vector<1x110x8xbf16> to vector<110x8xbf16>
      %152 = vector.shape_cast %4 : vector<110x8xbf16> to vector<1x110x8xbf16>
      tpu.vector_store %arg16[%c1_78, %c0_79, %c0_80], %152 {strides = array<i32>} : memref<3x110x8xbf16, #tpu.memory_space<vmem>>, vector<1x110x8xbf16>,
    } else {
    }
    %c2_i32_12 = arith.constant 2 : i32
    %22 = arith.cmpi eq, %15, %c2_i32_12 : i32
    %23 = arith.extui %22 : i1 to i32
    %c0_i32_13 = arith.constant 0 : i32
    %24 = arith.cmpi ne, %23, %c0_i32_13 : i32
    scf.if %24 {
      %c2_78 = arith.constant 2 : index
      %c0_79 = arith.constant 0 : index
      %c0_80 = arith.constant 0 : index
      %150 = vector.load %arg16[%c2_78, %c0_79, %c0_80] : memref<3x110x8xbf16, #tpu.memory_space<vmem>>, vector<1x110x8xbf16>
      %151 = vector.shape_cast %150 : vector<1x110x8xbf16> to vector<110x8xbf16>
      %152 = vector.shape_cast %4 : vector<110x8xbf16> to vector<1x110x8xbf16>
      tpu.vector_store %arg16[%c2_78, %c0_79, %c0_80], %152 {strides = array<i32>} : memref<3x110x8xbf16, #tpu.memory_space<vmem>>, vector<1x110x8xbf16>,
    } else {
    }
    %c0_i32_14 = arith.constant 0 : i32
    %25 = arith.addi %arg1, %c0_i32_14 : i32
    %c3_i32_15 = arith.constant 3 : i32
    %c0_i32_16 = arith.constant 0 : i32
    %26 = arith.cmpi eq, %c3_i32_15, %c0_i32_16 : i32
    %c1_i32_17 = arith.constant 1 : i32
    %27 = arith.select %26, %c1_i32_17, %c3_i32_15 : i32
    %28 = arith.remsi %25, %27 : i32
    %c0_i32_18 = arith.constant 0 : i32
    %29 = arith.cmpi ne, %28, %c0_i32_18 : i32
    %c0_i32_19 = arith.constant 0 : i32
    %30 = arith.cmpi slt, %28, %c0_i32_19 : i32
    %c0_i32_20 = arith.constant 0 : i32
    %31 = arith.cmpi slt, %27, %c0_i32_20 : i32
    %32 = arith.xori %30, %31 : i1
    %33 = arith.andi %32, %29 : i1
    %34 = arith.addi %28, %27 : i32
    %35 = arith.select %33, %34, %28 : i32
    %36 = arith.index_cast %35 : i32 to index
    %c0_21 = arith.constant 0 : index
    %c0_22 = arith.constant 0 : index
    %37 = vector.load %arg16[%36, %c0_21, %c0_22] : memref<3x110x8xbf16, #tpu.memory_space<vmem>>, vector<1x110x8xbf16>
    %38 = vector.shape_cast %37 : vector<1x110x8xbf16> to vector<110x8xbf16>
    %39 = vector.extract_strided_slice %38 {offsets = [0, 0], sizes = [80, 8], strides = [1, 1]} : vector<110x8xbf16> to vector<80x8xbf16>
    %40 = vector.extract_strided_slice %38 {offsets = [1, 0], sizes = [80, 8], strides = [1, 1]} : vector<110x8xbf16> to vector<80x8xbf16>
    %41 = vector.extract_strided_slice %38 {offsets = [2, 0], sizes = [80, 8], strides = [1, 1]} : vector<110x8xbf16> to vector<80x8xbf16>
    %42 = vector.extract_strided_slice %38 {offsets = [10, 0], sizes = [80, 8], strides = [1, 1]} : vector<110x8xbf16> to vector<80x8xbf16>
    %43 = vector.extract_strided_slice %38 {offsets = [11, 0], sizes = [80, 8], strides = [1, 1]} : vector<110x8xbf16> to vector<80x8xbf16>
    %44 = vector.extract_strided_slice %38 {offsets = [12, 0], sizes = [80, 8], strides = [1, 1]} : vector<110x8xbf16> to vector<80x8xbf16>
    %45 = vector.extract_strided_slice %38 {offsets = [20, 0], sizes = [80, 8], strides = [1, 1]} : vector<110x8xbf16> to vector<80x8xbf16>
    %46 = vector.extract_strided_slice %38 {offsets = [21, 0], sizes = [80, 8], strides = [1, 1]} : vector<110x8xbf16> to vector<80x8xbf16>
    %47 = vector.extract_strided_slice %38 {offsets = [22, 0], sizes = [80, 8], strides = [1, 1]} : vector<110x8xbf16> to vector<80x8xbf16>
    %48 = tpu.concatenate %39, %40, %41, %42, %43, %44, %45, %46, %47 in 1 : vector<80x8xbf16>, vector<80x8xbf16>, vector<80x8xbf16>, vector<80x8xbf16>, vector<80x8xbf16>, vector<80x8xbf16>, vector<80x8xbf16>, vector<80x8xbf16>, vector<80x8xbf16> -> vector<80x72xbf16>
    %c0_23 = arith.constant 0 : index
    %c0_24 = arith.constant 0 : index
    %c0_25 = arith.constant 0 : index
    %49 = vector.load %arg6[%c0_23, %c0_24, %c0_25] : memref<3x72x8xbf16, #tpu.memory_space<vmem>>, vector<1x72x8xbf16>
    %50 = vector.shape_cast %49 : vector<1x72x8xbf16> to vector<72x8xbf16>
    %cst = arith.constant dense<0.000000e+00> : vector<80x8xf32>
    %51 = tpu.matmul %48, %50, %cst {dimension_numbers = #tpu.dot_dimension_numbers<[1], [0], [0], [1], [0, 0, 1, 1], [], []>} : vector<80x72xbf16>, vector<72x8xbf16>, vector<80x8xf32> -> vector<80x8xf32>
    %c1_i32_26 = arith.constant 1 : i32
    %52 = arith.addi %arg1, %c1_i32_26 : i32
    %c3_i32_27 = arith.constant 3 : i32
    %c0_i32_28 = arith.constant 0 : i32
    %53 = arith.cmpi eq, %c3_i32_27, %c0_i32_28 : i32
    %c1_i32_29 = arith.constant 1 : i32
    %54 = arith.select %53, %c1_i32_29, %c3_i32_27 : i32
    %55 = arith.remsi %52, %54 : i32
    %c0_i32_30 = arith.constant 0 : i32
    %56 = arith.cmpi ne, %55, %c0_i32_30 : i32
    %c0_i32_31 = arith.constant 0 : i32
    %57 = arith.cmpi slt, %55, %c0_i32_31 : i32
    %c0_i32_32 = arith.constant 0 : i32
    %58 = arith.cmpi slt, %54, %c0_i32_32 : i32
    %59 = arith.xori %57, %58 : i1
    %60 = arith.andi %59, %56 : i1
    %61 = arith.addi %55, %54 : i32
    %62 = arith.select %60, %61, %55 : i32
    %63 = arith.index_cast %62 : i32 to index
    %c0_33 = arith.constant 0 : index
    %c0_34 = arith.constant 0 : index
    %64 = vector.load %arg16[%63, %c0_33, %c0_34] : memref<3x110x8xbf16, #tpu.memory_space<vmem>>, vector<1x110x8xbf16>
    %65 = vector.shape_cast %64 : vector<1x110x8xbf16> to vector<110x8xbf16>
    %66 = vector.extract_strided_slice %65 {offsets = [0, 0], sizes = [80, 8], strides = [1, 1]} : vector<110x8xbf16> to vector<80x8xbf16>
    %67 = vector.extract_strided_slice %65 {offsets = [1, 0], sizes = [80, 8], strides = [1, 1]} : vector<110x8xbf16> to vector<80x8xbf16>
    %68 = vector.extract_strided_slice %65 {offsets = [2, 0], sizes = [80, 8], strides = [1, 1]} : vector<110x8xbf16> to vector<80x8xbf16>
    %69 = vector.extract_strided_slice %65 {offsets = [10, 0], sizes = [80, 8], strides = [1, 1]} : vector<110x8xbf16> to vector<80x8xbf16>
    %70 = vector.extract_strided_slice %65 {offsets = [11, 0], sizes = [80, 8], strides = [1, 1]} : vector<110x8xbf16> to vector<80x8xbf16>
    %71 = vector.extract_strided_slice %65 {offsets = [12, 0], sizes = [80, 8], strides = [1, 1]} : vector<110x8xbf16> to vector<80x8xbf16>
    %72 = vector.extract_strided_slice %65 {offsets = [20, 0], sizes = [80, 8], strides = [1, 1]} : vector<110x8xbf16> to vector<80x8xbf16>
    %73 = vector.extract_strided_slice %65 {offsets = [21, 0], sizes = [80, 8], strides = [1, 1]} : vector<110x8xbf16> to vector<80x8xbf16>
    %74 = vector.extract_strided_slice %65 {offsets = [22, 0], sizes = [80, 8], strides = [1, 1]} : vector<110x8xbf16> to vector<80x8xbf16>
    %75 = tpu.concatenate %66, %67, %68, %69, %70, %71, %72, %73, %74 in 1 : vector<80x8xbf16>, vector<80x8xbf16>, vector<80x8xbf16>, vector<80x8xbf16>, vector<80x8xbf16>, vector<80x8xbf16>, vector<80x8xbf16>, vector<80x8xbf16>, vector<80x8xbf16> -> vector<80x72xbf16>
    %c1 = arith.constant 1 : index
    %c0_35 = arith.constant 0 : index
    %c0_36 = arith.constant 0 : index
    %76 = vector.load %arg6[%c1, %c0_35, %c0_36] : memref<3x72x8xbf16, #tpu.memory_space<vmem>>, vector<1x72x8xbf16>
    %77 = vector.shape_cast %76 : vector<1x72x8xbf16> to vector<72x8xbf16>
    %cst_37 = arith.constant dense<0.000000e+00> : vector<80x8xf32>
    %78 = tpu.matmul %75, %77, %cst_37 {dimension_numbers = #tpu.dot_dimension_numbers<[1], [0], [0], [1], [0, 0, 1, 1], [], []>} : vector<80x72xbf16>, vector<72x8xbf16>, vector<80x8xf32> -> vector<80x8xf32>
    %79 = arith.addf %51, %78 : vector<80x8xf32>
    %c2_i32_38 = arith.constant 2 : i32
    %80 = arith.addi %arg1, %c2_i32_38 : i32
    %c3_i32_39 = arith.constant 3 : i32
    %c0_i32_40 = arith.constant 0 : i32
    %81 = arith.cmpi eq, %c3_i32_39, %c0_i32_40 : i32
    %c1_i32_41 = arith.constant 1 : i32
    %82 = arith.select %81, %c1_i32_41, %c3_i32_39 : i32
    %83 = arith.remsi %80, %82 : i32
    %c0_i32_42 = arith.constant 0 : i32
    %84 = arith.cmpi ne, %83, %c0_i32_42 : i32
    %c0_i32_43 = arith.constant 0 : i32
    %85 = arith.cmpi slt, %83, %c0_i32_43 : i32
    %c0_i32_44 = arith.constant 0 : i32
    %86 = arith.cmpi slt, %82, %c0_i32_44 : i32
    %87 = arith.xori %85, %86 : i1
    %88 = arith.andi %87, %84 : i1
    %89 = arith.addi %83, %82 : i32
    %90 = arith.select %88, %89, %83 : i32
    %91 = arith.index_cast %90 : i32 to index
    %c0_45 = arith.constant 0 : index
    %c0_46 = arith.constant 0 : index
    %92 = vector.load %arg16[%91, %c0_45, %c0_46] : memref<3x110x8xbf16, #tpu.memory_space<vmem>>, vector<1x110x8xbf16>
    %93 = vector.shape_cast %92 : vector<1x110x8xbf16> to vector<110x8xbf16>
    %94 = vector.extract_strided_slice %93 {offsets = [0, 0], sizes = [80, 8], strides = [1, 1]} : vector<110x8xbf16> to vector<80x8xbf16>
    %95 = vector.extract_strided_slice %93 {offsets = [1, 0], sizes = [80, 8], strides = [1, 1]} : vector<110x8xbf16> to vector<80x8xbf16>
    %96 = vector.extract_strided_slice %93 {offsets = [2, 0], sizes = [80, 8], strides = [1, 1]} : vector<110x8xbf16> to vector<80x8xbf16>
    %97 = vector.extract_strided_slice %93 {offsets = [10, 0], sizes = [80, 8], strides = [1, 1]} : vector<110x8xbf16> to vector<80x8xbf16>
    %98 = vector.extract_strided_slice %93 {offsets = [11, 0], sizes = [80, 8], strides = [1, 1]} : vector<110x8xbf16> to vector<80x8xbf16>
    %99 = vector.extract_strided_slice %93 {offsets = [12, 0], sizes = [80, 8], strides = [1, 1]} : vector<110x8xbf16> to vector<80x8xbf16>
    %100 = vector.extract_strided_slice %93 {offsets = [20, 0], sizes = [80, 8], strides = [1, 1]} : vector<110x8xbf16> to vector<80x8xbf16>
    %101 = vector.extract_strided_slice %93 {offsets = [21, 0], sizes = [80, 8], strides = [1, 1]} : vector<110x8xbf16> to vector<80x8xbf16>
    %102 = vector.extract_strided_slice %93 {offsets = [22, 0], sizes = [80, 8], strides = [1, 1]} : vector<110x8xbf16> to vector<80x8xbf16>
    %103 = tpu.concatenate %94, %95, %96, %97, %98, %99, %100, %101, %102 in 1 : vector<80x8xbf16>, vector<80x8xbf16>, vector<80x8xbf16>, vector<80x8xbf16>, vector<80x8xbf16>, vector<80x8xbf16>, vector<80x8xbf16>, vector<80x8xbf16>, vector<80x8xbf16> -> vector<80x72xbf16>
    %c2 = arith.constant 2 : index
    %c0_47 = arith.constant 0 : index
    %c0_48 = arith.constant 0 : index
    %104 = vector.load %arg6[%c2, %c0_47, %c0_48] : memref<3x72x8xbf16, #tpu.memory_space<vmem>>, vector<1x72x8xbf16>
    %105 = vector.shape_cast %104 : vector<1x72x8xbf16> to vector<72x8xbf16>
    %cst_49 = arith.constant dense<0.000000e+00> : vector<80x8xf32>
    %106 = tpu.matmul %103, %105, %cst_49 {dimension_numbers = #tpu.dot_dimension_numbers<[1], [0], [0], [1], [0, 0, 1, 1], [], []>} : vector<80x72xbf16>, vector<72x8xbf16>, vector<80x8xf32> -> vector<80x8xf32>
    %107 = arith.addf %79, %106 : vector<80x8xf32>
    %c0_50 = arith.constant 0 : index
    %c0_51 = arith.constant 0 : index
    %108 = vector.load %arg7[%c0_50, %c0_51] : memref<1x8xf32, #tpu.memory_space<vmem>>, vector<1x8xf32>
    %109 = vector.broadcast %108 : vector<1x8xf32> to vector<80x8xf32>
    %110 = arith.addf %107, %109 : vector<80x8xf32>
    %c0_52 = arith.constant 0 : index
    %c0_53 = arith.constant 0 : index
    %c0_54 = arith.constant 0 : index
    %c0_55 = arith.constant 0 : index
    %111 = vector.load %arg5[%c0_52, %c0_53, %c0_54, %c0_55] : memref<1x1x80x1xf32, #tpu.memory_space<vmem>>, vector<1x1x80x1xf32>
    %112 = vector.shape_cast %111 : vector<1x1x80x1xf32> to vector<80x1xf32>
    %c0_56 = arith.constant 0 : index
    %c0_57 = arith.constant 0 : index
    %113 = vector.load %arg8[%c0_56, %c0_57] : memref<1x8xf32, #tpu.memory_space<vmem>>, vector<1x8xf32>
    %114 = vector.broadcast %112 : vector<80x1xf32> to vector<80x8xf32>
    %115 = vector.broadcast %113 : vector<1x8xf32> to vector<80x8xf32>
    %116 = arith.mulf %114, %115 : vector<80x8xf32>
    %c0_58 = arith.constant 0 : index
    %c0_59 = arith.constant 0 : index
    %117 = vector.load %arg9[%c0_58, %c0_59] : memref<1x8xf32, #tpu.memory_space<vmem>>, vector<1x8xf32>
    %118 = vector.broadcast %117 : vector<1x8xf32> to vector<80x8xf32>
    %119 = arith.addf %116, %118 : vector<80x8xf32>
    %120 = arith.truncf %110 : vector<80x8xf32> to vector<80x8xbf16>
    %c0_60 = arith.constant 0 : index
    %c0_61 = arith.constant 0 : index
    %121 = vector.load %arg10[%c0_60, %c0_61] : memref<8x8xbf16, #tpu.memory_space<vmem>>, vector<8x8xbf16>
    %cst_62 = arith.constant dense<0.000000e+00> : vector<80x8xf32>
    %122 = tpu.matmul %120, %121, %cst_62 {dimension_numbers = #tpu.dot_dimension_numbers<[1], [0], [0], [1], [0, 0, 1, 1], [], []>} : vector<80x8xbf16>, vector<8x8xbf16>, vector<80x8xf32> -> vector<80x8xf32>
    %c0_63 = arith.constant 0 : index
    %c0_64 = arith.constant 0 : index
    %123 = vector.load %arg11[%c0_63, %c0_64] : memref<1x8xf32, #tpu.memory_space<vmem>>, vector<1x8xf32>
    %124 = vector.broadcast %112 : vector<80x1xf32> to vector<80x8xf32>
    %125 = vector.broadcast %123 : vector<1x8xf32> to vector<80x8xf32>
    %126 = arith.mulf %124, %125 : vector<80x8xf32>
    %127 = arith.addf %122, %126 : vector<80x8xf32>
    %c0_65 = arith.constant 0 : index
    %c0_66 = arith.constant 0 : index
    %128 = vector.load %arg12[%c0_65, %c0_66] : memref<1x8xf32, #tpu.memory_space<vmem>>, vector<1x8xf32>
    %129 = vector.broadcast %128 : vector<1x8xf32> to vector<80x8xf32>
    %130 = arith.addf %127, %129 : vector<80x8xf32>
    %cst_67 = arith.constant 0.000000e+00 : f32
    %131 = vector.broadcast %cst_67 : f32 to vector<80x8xf32>
    %132 = arith.maximumf %130, %131 : vector<80x8xf32>
    %133 = arith.truncf %132 : vector<80x8xf32> to vector<80x8xbf16>
    %c0_68 = arith.constant 0 : index
    %c0_69 = arith.constant 0 : index
    %134 = vector.load %arg13[%c0_68, %c0_69] : memref<8x8xbf16, #tpu.memory_space<vmem>>, vector<8x8xbf16>
    %cst_70 = arith.constant dense<0.000000e+00> : vector<80x8xf32>
    %135 = tpu.matmul %133, %134, %cst_70 {dimension_numbers = #tpu.dot_dimension_numbers<[1], [0], [0], [1], [0, 0, 1, 1], [], []>} : vector<80x8xbf16>, vector<8x8xbf16>, vector<80x8xf32> -> vector<80x8xf32>
    %c0_71 = arith.constant 0 : index
    %c0_72 = arith.constant 0 : index
    %136 = vector.load %arg14[%c0_71, %c0_72] : memref<1x8xf32, #tpu.memory_space<vmem>>, vector<1x8xf32>
    %137 = vector.broadcast %136 : vector<1x8xf32> to vector<80x8xf32>
    %138 = arith.addf %135, %137 : vector<80x8xf32>
    %139 = arith.negf %138 : vector<80x8xf32>
    %140 = math.exp %139 : vector<80x8xf32>
    %cst_73 = arith.constant 1.000000e+00 : f32
    %141 = vector.broadcast %cst_73 : f32 to vector<80x8xf32>
    %142 = arith.addf %141, %140 : vector<80x8xf32>
    %143 = arith.divf %141, %142 : vector<80x8xf32>
    %144 = arith.subf %110, %119 : vector<80x8xf32>
    %145 = arith.mulf %143, %144 : vector<80x8xf32>
    %146 = arith.addf %119, %145 : vector<80x8xf32>
    %c0_74 = arith.constant 0 : index
    %c0_75 = arith.constant 0 : index
    %c0_76 = arith.constant 0 : index
    %c0_77 = arith.constant 0 : index
    %147 = vector.load %arg15[%c0_74, %c0_75, %c0_76, %c0_77] : memref<1x1x80x8xf32, #tpu.memory_space<vmem>>, vector<1x1x80x8xf32>
    %148 = vector.shape_cast %147 : vector<1x1x80x8xf32> to vector<80x8xf32>
    %149 = vector.shape_cast %146 : vector<80x8xf32> to vector<1x1x80x8xf32>
    tpu.vector_store %arg15[%c0_74, %c0_75, %c0_76, %c0_77], %149 {strides = array<i32>} : memref<1x1x80x8xf32, #tpu.memory_space<vmem>>, vector<1x1x80x8xf32>,
    return
  }
  func.func @transform_0(%arg0: i32, %arg1: i32) -> (i32, i32, i32, i32) {
    %c0_i32 = arith.constant 0 : i32
    %c0_i32_0 = arith.constant 0 : i32
    %c0_i32_1 = arith.constant 0 : i32
    %c0_i32_2 = arith.constant 0 : i32
    return %arg0, %c0_i32, %c0_i32_0, %c0_i32_1 : i32, i32, i32, i32
  }
  func.func @transform_1(%arg0: i32, %arg1: i32) -> (i32, i32, i32, i32) {
    %c1_i32 = arith.constant 1 : i32
    %c0_i32 = arith.constant 0 : i32
    %c0_i32_0 = arith.constant 0 : i32
    %c0_i32_1 = arith.constant 0 : i32
    return %arg0, %c1_i32, %c0_i32, %c0_i32_0 : i32, i32, i32, i32
  }
  func.func @transform_2(%arg0: i32, %arg1: i32) -> (i32, i32, i32, i32) {
    %c2_i32 = arith.constant 2 : i32
    %0 = arith.addi %arg1, %c2_i32 : i32
    %c0_i32 = arith.constant 0 : i32
    %c0_i32_0 = arith.constant 0 : i32
    %c0_i32_1 = arith.constant 0 : i32
    return %arg0, %0, %c0_i32, %c0_i32_0 : i32, i32, i32, i32
  }
  func.func @transform_3(%arg0: i32, %arg1: i32) -> (i32, i32, i32, i32) {
    %c0_i32 = arith.constant 0 : i32
    %c0_i32_0 = arith.constant 0 : i32
    %c0_i32_1 = arith.constant 0 : i32
    return %arg0, %arg1, %c0_i32, %c0_i32_0 : i32, i32, i32, i32
  }
  func.func @transform_4(%arg0: i32, %arg1: i32) -> (i32, i32, i32) {
    %c0_i32 = arith.constant 0 : i32
    %c0_i32_0 = arith.constant 0 : i32
    %c0_i32_1 = arith.constant 0 : i32
    %c0_i32_2 = arith.constant 0 : i32
    return %c0_i32, %c0_i32_0, %c0_i32_1 : i32, i32, i32
  }
  func.func @transform_5(%arg0: i32, %arg1: i32) -> (i32, i32) {
    %c0_i32 = arith.constant 0 : i32
    %c0_i32_0 = arith.constant 0 : i32
    %c0_i32_1 = arith.constant 0 : i32
    return %c0_i32, %c0_i32_0 : i32, i32
  }
  func.func @transform_6(%arg0: i32, %arg1: i32) -> (i32, i32) {
    %c0_i32 = arith.constant 0 : i32
    %c0_i32_0 = arith.constant 0 : i32
    %c0_i32_1 = arith.constant 0 : i32
    return %c0_i32, %c0_i32_0 : i32, i32
  }
  func.func @transform_7(%arg0: i32, %arg1: i32) -> (i32, i32) {
    %c0_i32 = arith.constant 0 : i32
    %c0_i32_0 = arith.constant 0 : i32
    %c0_i32_1 = arith.constant 0 : i32
    return %c0_i32, %c0_i32_0 : i32, i32
  }
  func.func @transform_8(%arg0: i32, %arg1: i32) -> (i32, i32) {
    %c0_i32 = arith.constant 0 : i32
    %c0_i32_0 = arith.constant 0 : i32
    %c0_i32_1 = arith.constant 0 : i32
    return %c0_i32, %c0_i32_0 : i32, i32
  }
  func.func @transform_9(%arg0: i32, %arg1: i32) -> (i32, i32) {
    %c0_i32 = arith.constant 0 : i32
    %c0_i32_0 = arith.constant 0 : i32
    %c0_i32_1 = arith.constant 0 : i32
    return %c0_i32, %c0_i32_0 : i32, i32
  }
  func.func @transform_10(%arg0: i32, %arg1: i32) -> (i32, i32) {
    %c0_i32 = arith.constant 0 : i32
    %c0_i32_0 = arith.constant 0 : i32
    %c0_i32_1 = arith.constant 0 : i32
    return %c0_i32, %c0_i32_0 : i32, i32
  }
  func.func @transform_11(%arg0: i32, %arg1: i32) -> (i32, i32) {
    %c0_i32 = arith.constant 0 : i32
    %c0_i32_0 = arith.constant 0 : i32
    %c0_i32_1 = arith.constant 0 : i32
    return %c0_i32, %c0_i32_0 : i32, i32
  }
  func.func @transform_12(%arg0: i32, %arg1: i32) -> (i32, i32) {
    %c0_i32 = arith.constant 0 : i32
    %c0_i32_0 = arith.constant 0 : i32
    %c0_i32_1 = arith.constant 0 : i32
    return %c0_i32, %c0_i32_0 : i32, i32
  }
  func.func @transform_13(%arg0: i32, %arg1: i32) -> (i32, i32, i32, i32) {
    %c0_i32 = arith.constant 0 : i32
    %c0_i32_0 = arith.constant 0 : i32
    %c0_i32_1 = arith.constant 0 : i32
    return %arg0, %arg1, %c0_i32, %c0_i32_0 : i32, i32, i32, i32
  }
}

</mosaic_0001>

<bundles_post_ra>
// kernel: _lambda_.1
= control target key start
LH: loop header
LB: loop body
LE: loop exit
PB: predicated region body
PF: predicated region fallthrough
CT: control target
= control target key end

     0   :  { %s3577_s25 = smov 0   ;;  %s3579_s26 = smov 0   ;;  %s5449_s0 = inlined_call_operand.vmem [shape: bf16[2,6,110,8], index: 0, kind: input, shape index: {}, may-alias: {0,1,2}]   ;;  %s5450_s1 = inlined_call_operand.vmem [shape: bf16[2,6,110,8], index: 1, kind: input, shape index: {}, may-alias: {0,1,2}]   ;;  %s5451_s2 = inlined_call_operand.vmem [shape: bf16[2,6,110,8], index: 2, kind: input, shape index: {}, may-alias: {0,1,2}]   ;;  %s5452_s3 = inlined_call_operand.vmem [shape: f32[2,4,80,1], index: 3, kind: input, shape index: {}]   ;;  %s5453_s4 = inlined_call_operand.vmem [shape: bf16[3,72,8], index: 4, kind: input, shape index: {}]   ;;  %s5454_s5 = inlined_call_operand.vmem [shape: f32[1,8], index: 5, kind: input, shape index: {}]   ;;  %s5455_s6 = inlined_call_operand.vmem [shape: f32[1,8], index: 6, kind: input, shape index: {}]   ;;  %s5456_s7 = inlined_call_operand.vmem [shape: f32[1,8], index: 7, kind: input, shape index: {}]   ;;  %s5457_s8 = inlined_call_operand.vmem [shape: bf16[8,8], index: 8, kind: input, shape index: {}]   ;;  %s5458_s9 = inlined_call_operand.vmem [shape: f32[1,8], index: 9, kind: input, shape index: {}]   ;;  %s5459_s10 = inlined_call_operand.vmem [shape: f32[1,8], index: 10, kind: input, shape index: {}]   ;;  %s5460_s11 = inlined_call_operand.vmem [shape: bf16[8,8], index: 11, kind: input, shape index: {}]   ;;  %s5461_s12 = inlined_call_operand.vmem [shape: f32[1,8], index: 12, kind: input, shape index: {}]   ;;  %s5462_s13 = inlined_call_operand.vmem [shape: f32[2,4,80,8], index: 13, kind: output, shape index: {}]  }
   0x1   :  { %5469 = sst [smem:[#allocation8_spill]] %s5449_s0  ;;  %s3581_s27 = smov 0  }
   0x2   :  { %5470 = sst [smem:[#allocation9_spill]] %s5454_s5  ;;  %s3583_s28 = smov 0  }
   0x3   :  { %5471 = sst [smem:[#allocation10_spill]] %s5458_s9  ;;  %s3585_s29 = smov 0  }
   0x4   :  { %5472 = sst [smem:[#allocation11_spill]] %s5459_s10 }
   0x5   :  { %5473 = sst [smem:[#allocation12_spill]] %s5460_s11 }
   0x6   :  { %5474 = sst [smem:[#allocation13_spill]] %s5461_s12 }
   0x7 LB: > { %5475 = sst [smem:[#allocation3_spill]] %s3486_s27  ;;  %s32_s30 = sadd.s32 1, %s3486_s27  ;;  %s3494_s29 = sphi %s3585_s29, %s23_s29   ;;  %s3490_s28 = sphi %s3583_s28, %s5496_s28   ;;  %s3486_s27 = sphi %s3581_s27, %s5495_s27   ;;  %s3482_s26 = sphi %s3579_s26, %s5494_s26   ;;  %s3478_s25 = sphi %s3577_s25, %s5493_s25  }
   0x8   : > { %5476 = sst [smem:[#allocation4_spill]] %s3490_s28  ;;  %s35_s14 = sadd.s32 1, %s3490_s28 }
   0x9   : > { %5477 = sst [smem:[#allocation5_spill]] %s3494_s29  ;;  %p33_p0 = scmp.ge.s32.totalorder %s32_s30, 4 }
   0xa   : > { %p2951_p1 = scmp.ge.s32.totalorder %s3494_s29, 1  ;;  %p448_p2 = scmp.lt.s32.totalorder %s3494_s29, 9 }
   0xb   : > { %s5498_s30 = smov (%p33_p0, %s32_s30), 0  ;;  %s5500_s14 = smov (!%p33_p0, %s35_s14), %s3490_s28 }
   0xc   : > { %5478 = sst [smem:[#allocation6_spill]] %s5498_s30  ;;  %p449_p3 = pnand %p2951_p1, %p448_p2 }
   0xd   : > { %p37_p4 = scmp.ge.s32.totalorder %s5500_s14, 2  ;;  %p521_p5 = scmp.lt.s32.totalorder (!%p449_p3), %s3482_s26, 1 }
   0xe   : > { %452 = sbr.rel (%p449_p3) target bundleno = 1148 (0x47c), region = 72  ;;  %s3610_s15 = sadd.s32 (!%p449_p3), 2, %s3478_s25 }
   0xf   : > { %s5502_s14 = smov (%p37_p4, %s5500_s14), 0  ;;  %p535_p6 = scmp.lt.s32.totalorder (!%p449_p3), %s3610_s15, 5 }
  0x10   : > { %5479 = sst [smem:[#allocation7_spill]] %s5502_s14  ;;  %p545_p7 = scmp.lt.s32.totalorder (!%p449_p3), %s3478_s25, 3 }
  0x11   : > { %s5480_s0 = sld [smem:[#allocation8_spill]] (!%p449_p3)  ;;  %p2957_p8 = scmp.ne.s32.totalorder (!%p449_p3), %s3478_s25, 0 }
  0x13   : > { %s5504_s26 = smov (!%p521_p5, %s3482_s26), 1 }
  0x14   : > { %s536_s16 = scalar_select %p535_p6, %s3610_s15, 5 }
  0x15   : > { %s3294_s17 = smul.u32 336, %s5504_s26 }
  0x16   : > { %s3295_s18 = smul.u32 14, %s536_s16 }
  0x17   : > { %s3618_s21 = scalar_lea.vmem %s5480_s0, %s3294_s17  ;;  %s3623_s24 = scalar_lea.vmem %s5450_s1, %s3294_s17 }
  0x18   : > { %s3296_s14 = smul.u32 84, %s5504_s26 }
  0x19   : > { %s546_s30 = scalar_select %p545_p7, %s3478_s25, 3 }
  0x1a   : > { %s539_s28 = sadd.s32 %s3296_s14, %s3295_s18  ;;  %s3298_s27 = smul.u32 40, %s5504_s26 }
  0x1b   : > { %s2954_s29 = sshll.u32 %s539_s28, 2  ;;  %s3297_s12 = smul.u32 10, %s546_s30 }
  0x1c   : > { %s3629_s16 = scalar_lea.vmem %s5451_s2, %s2954_s29  ;;  %565 = sbr.rel (%p2957_p8) target bundleno = 53 (0x35), region = 76 }
  0x1d   : > { %s549_s11 = sadd.s32 %s3298_s27, %s3297_s12 }
  0x1e   : > { %s2955_s19 = sshll.u32 %s549_s11, 3 }
  0x1f   : > { %s3634_s5 = scalar_lea.vmem %s5452_s3, %s2955_s19  ;;  %s3639_s23 = scalar_lea.vmem %s5462_s13, %s2955_s19 }
  0x21   : > { %v566_v0 = vld [vmem:[%s3618_s21] sm:$0xf]  ;;  %vm580_vm0 = vcmask 60416   ;;  %v567_v1 = vld [vmem:[%s3618_s21 + $0x4] sm:$0xf]  ;;  %vm594_vm1 = vcmask 59392  }
  0x22   : > { %581 = vst.msk [vmem:[#allocation2] sm:$0xf] %vm580_vm0, %v566_v0  ;;  %582 = vst.msk [vmem:[#allocation2 + $0x4] sm:$0xf] %vm580_vm0, %v567_v1  ;;  %v568_v2 = vld [vmem:[%s3618_s21 + $0x8] sm:$0xf] }
  0x23   : > { %v569_v3 = vld [vmem:[%s3618_s21 + $0xc] sm:$0xf]  ;;  %v570_v4 = vld [vmem:[%s3618_s21 + $0x10] sm:$0xf]  ;;  %583 = vst.msk [vmem:[#allocation2 + $0x8] sm:$0xf] %vm580_vm0, %v568_v2 }
  0x24   : > { %584 = vst.msk [vmem:[#allocation2 + $0xc] sm:$0xf] %vm580_vm0, %v569_v3  ;;  %585 = vst.msk [vmem:[#allocation2 + $0x10] sm:$0xf] %vm580_vm0, %v570_v4  ;;  %v571_v5 = vld [vmem:[%s3618_s21 + $0x14] sm:$0xf] }
  0x25   : > { %v572_v6 = vld [vmem:[%s3618_s21 + $0x18] sm:$0xf]  ;;  %v573_v7 = vld [vmem:[%s3618_s21 + $0x1c] sm:$0xf]  ;;  %586 = vst.msk [vmem:[#allocation2 + $0x14] sm:$0xf] %vm580_vm0, %v571_v5 }
  0x26   : > { %587 = vst.msk [vmem:[#allocation2 + $0x18] sm:$0xf] %vm580_vm0, %v572_v6  ;;  %588 = vst.msk [vmem:[#allocation2 + $0x1c] sm:$0xf] %vm580_vm0, %v573_v7  ;;  %v574_v8 = vld [vmem:[%s3618_s21 + $0x20] sm:$0xf] }
  0x27   : > { %v575_v9 = vld [vmem:[%s3618_s21 + $0x24] sm:$0xf]  ;;  %v576_v10 = vld [vmem:[%s3618_s21 + $0x28] sm:$0xf]  ;;  %589 = vst.msk [vmem:[#allocation2 + $0x20] sm:$0xf] %vm580_vm0, %v574_v8 }
  0x28   : > { %590 = vst.msk [vmem:[#allocation2 + $0x24] sm:$0xf] %vm580_vm0, %v575_v9  ;;  %591 = vst.msk [vmem:[#allocation2 + $0x28] sm:$0xf] %vm580_vm0, %v576_v10  ;;  %v577_v11 = vld [vmem:[%s3618_s21 + $0x2c] sm:$0xf] }
  0x29   : > { %v578_v12 = vld [vmem:[%s3618_s21 + $0x30] sm:$0xf]  ;;  %v579_v13 = vld [vmem:[%s3618_s21 + $0x34] sm:$0x7]  ;;  %592 = vst.msk [vmem:[#allocation2 + $0x2c] sm:$0xf] %vm580_vm0, %v577_v11 }
  0x2a   : > { %593 = vst.msk [vmem:[#allocation2 + $0x30] sm:$0xf] %vm580_vm0, %v578_v12  ;;  %v2958_v14 = vld [vmem:[%s3623_s24 + $0x38] sm:$0xf]  ;;  %v2959_v15 = vld [vmem:[%s3623_s24 + $0x3c] sm:$0xf] }
  0x2b   : > { %595 = vst.msk [vmem:[#allocation2 + $0x34] sm:$0x7] %vm594_vm1, %v579_v13  ;;  %v2960_v16 = vld [vmem:[%s3623_s24 + $0x40] sm:$0xf]  ;;  %v2961_v17 = vld [vmem:[%s3623_s24 + $0x44] sm:$0xf] }
  0x2c   : > { %611 = vst.msk [vmem:[#allocation2 + $0x38] sm:$0xf] %vm580_vm0, %v2958_v14  ;;  %612 = vst.msk [vmem:[#allocation2 + $0x3c] sm:$0xf] %vm580_vm0, %v2959_v15  ;;  %v2962_v18 = vld [vmem:[%s3623_s24 + $0x48] sm:$0xf] }
  0x2d   : > { %613 = vst.msk [vmem:[#allocation2 + $0x40] sm:$0xf] %vm580_vm0, %v2960_v16  ;;  %v2963_v19 = vld [vmem:[%s3623_s24 + $0x4c] sm:$0xf]  ;;  %614 = vst.msk [vmem:[#allocation2 + $0x44] sm:$0xf] %vm580_vm0, %v2961_v17 }
  0x2e   : > { %615 = vst.msk [vmem:[#allocation2 + $0x48] sm:$0xf] %vm580_vm0, %v2962_v18  ;;  %616 = vst.msk [vmem:[#allocation2 + $0x4c] sm:$0xf] %vm580_vm0, %v2963_v19  ;;  %v2964_v20 = vld [vmem:[%s3623_s24 + $0x50] sm:$0xf] }
  0x2f   : > { %v2965_v21 = vld [vmem:[%s3623_s24 + $0x54] sm:$0xf]  ;;  %v2966_v22 = vld [vmem:[%s3623_s24 + $0x58] sm:$0xf]  ;;  %617 = vst.msk [vmem:[#allocation2 + $0x50] sm:$0xf] %vm580_vm0, %v2964_v20 }
  0x30   : > { %618 = vst.msk [vmem:[#allocation2 + $0x54] sm:$0xf] %vm580_vm0, %v2965_v21  ;;  %619 = vst.msk [vmem:[#allocation2 + $0x58] sm:$0xf] %vm580_vm0, %v2966_v22  ;;  %v2967_v23 = vld [vmem:[%s3623_s24 + $0x5c] sm:$0xf] }
  0x31   : > { %v2968_v24 = vld [vmem:[%s3623_s24 + $0x60] sm:$0xf]  ;;  %v2969_v25 = vld [vmem:[%s3623_s24 + $0x64] sm:$0xf]  ;;  %620 = vst.msk [vmem:[#allocation2 + $0x5c] sm:$0xf] %vm580_vm0, %v2967_v23 }
  0x32   : > { %621 = vst.msk [vmem:[#allocation2 + $0x60] sm:$0xf] %vm580_vm0, %v2968_v24  ;;  %622 = vst.msk [vmem:[#allocation2 + $0x64] sm:$0xf] %vm580_vm0, %v2969_v25  ;;  %v2970_v26 = vld [vmem:[%s3623_s24 + $0x68] sm:$0xf] }
  0x33   : > { %v2971_v27 = vld [vmem:[%s3623_s24 + $0x6c] sm:$0x7]  ;;  %623 = vst.msk [vmem:[#allocation2 + $0x68] sm:$0xf] %vm580_vm0, %v2970_v26 }
  0x34   : > { %624 = vst.msk [vmem:[#allocation2 + $0x6c] sm:$0x7] %vm594_vm1, %v2971_v27 }
  0x35 PF: > { %v3699_v28 = vld [vmem:[%s3629_s16] sm:$0xf]  ;;  %v3702_v29 = vld [vmem:[%s3629_s16 + $0x4] sm:$0xf]  ;;  %v3705_v30 = vld [vmem:[%s3629_s16 + $0x8] sm:$0xf] }
  0x36   : > { %v3708_v31 = vld [vmem:[%s3629_s16 + $0xc] sm:$0xf]  ;;  %v3711_v32 = vld [vmem:[%s3629_s16 + $0x10] sm:$0xf]  ;;  %v3714_v33 = vld [vmem:[%s3629_s16 + $0x14] sm:$0xf] }
  0x37   : > { %v3717_v34 = vld [vmem:[%s3629_s16 + $0x18] sm:$0xf]  ;;  %v3720_v35 = vld [vmem:[%s3629_s16 + $0x1c] sm:$0xf]  ;;  %v3723_v36 = vld [vmem:[%s3629_s16 + $0x20] sm:$0xf] }
  0x38   : > { %v3726_v37 = vld [vmem:[%s3629_s16 + $0x24] sm:$0xf]  ;;  %v3729_v38 = vld [vmem:[%s3629_s16 + $0x28] sm:$0xf]  ;;  %v3732_v39 = vld [vmem:[%s3629_s16 + $0x2c] sm:$0xf] }
  0x39   : > { %v3735_v40 = vld [vmem:[%s3629_s16 + $0x30] sm:$0xf]  ;;  %v3738_v41 = vld [vmem:[%s3629_s16 + $0x34] sm:$0x7]  ;;  %s641_s0 = ssub.s32 0, %s3610_s15  ;;  %p640_p9 = scmp.lt.s32.totalorder %s3610_s15, 0 }
  0x3a   : > { %s2972_s9 = smin.u32 %s641_s0, %s3610_s15 }
  0x3b   : > { %3351 = sdivrem.u32 %s2972_s9, 3 }
  0x44   : > { %s3352_s10 = spop.drf %3351 }
  0x45   : > { %s645_s11 = ssub.s32 0, %s3352_s10 }
  0x46   : > { %s5506_s11 = smov (!%p640_p9, %s645_s11), %s3352_s10 }
  0x47   : > { %p2974_p10 = scmp.lt.s32.totalorder %s5506_s11, 0  ;;  %s651_s12 = sadd.s32 3, %s5506_s11 }
  0x49   : > { %s5508_s12 = smov (!%p2974_p10, %s651_s12), %s5506_s11 }
  0x4a   : > { %p2975_p11 = scmp.ne.s32.totalorder %s5508_s12, 0 }
  0x4c   : > { %656 = sbr.rel (%p2975_p11) target bundleno = 90 (0x5a), region = 80 }
  0x51   : > { %vm657_vm2 = vcmask 60416   ;;  %vm671_vm3 = vcmask 59392  }
  0x52   : > { %658 = vst.msk [vmem:[#allocation2] sm:$0xf] %vm657_vm2, %v3699_v28  ;;  %659 = vst.msk [vmem:[#allocation2 + $0x4] sm:$0xf] %vm657_vm2, %v3702_v29 }
  0x53   : > { %660 = vst.msk [vmem:[#allocation2 + $0x8] sm:$0xf] %vm657_vm2, %v3705_v30  ;;  %661 = vst.msk [vmem:[#allocation2 + $0xc] sm:$0xf] %vm657_vm2, %v3708_v31 }
  0x54   : > { %662 = vst.msk [vmem:[#allocation2 + $0x10] sm:$0xf] %vm657_vm2, %v3711_v32  ;;  %663 = vst.msk [vmem:[#allocation2 + $0x14] sm:$0xf] %vm657_vm2, %v3714_v33 }
  0x55   : > { %664 = vst.msk [vmem:[#allocation2 + $0x18] sm:$0xf] %vm657_vm2, %v3717_v34  ;;  %665 = vst.msk [vmem:[#allocation2 + $0x1c] sm:$0xf] %vm657_vm2, %v3720_v35 }
  0x56   : > { %666 = vst.msk [vmem:[#allocation2 + $0x20] sm:$0xf] %vm657_vm2, %v3723_v36  ;;  %667 = vst.msk [vmem:[#allocation2 + $0x24] sm:$0xf] %vm657_vm2, %v3726_v37 }
  0x57   : > { %668 = vst.msk [vmem:[#allocation2 + $0x28] sm:$0xf] %vm657_vm2, %v3729_v38  ;;  %669 = vst.msk [vmem:[#allocation2 + $0x2c] sm:$0xf] %vm657_vm2, %v3732_v39 }
  0x58   : > { %670 = vst.msk [vmem:[#allocation2 + $0x30] sm:$0xf] %vm657_vm2, %v3735_v40 }
  0x59   : > { %672 = vst.msk [vmem:[#allocation2 + $0x34] sm:$0x7] %vm671_vm3, %v3738_v41 }
  0x5a PF: > { %p2976_p12 = scmp.ne.s32.totalorder %s5508_s12, 1 }
  0x5c   : > { %676 = sbr.rel (%p2976_p12) target bundleno = 106 (0x6a), region = 84 }
  0x61   : > { %vm678_vm4 = vcmask 60416   ;;  %vm692_vm5 = vcmask 59392  }
  0x62   : > { %679 = vst.msk [vmem:[#allocation2 + $0x38] sm:$0xf] %vm678_vm4, %v3699_v28  ;;  %680 = vst.msk [vmem:[#allocation2 + $0x3c] sm:$0xf] %vm678_vm4, %v3702_v29 }
  0x63   : > { %681 = vst.msk [vmem:[#allocation2 + $0x40] sm:$0xf] %vm678_vm4, %v3705_v30  ;;  %682 = vst.msk [vmem:[#allocation2 + $0x44] sm:$0xf] %vm678_vm4, %v3708_v31 }
  0x64   : > { %683 = vst.msk [vmem:[#allocation2 + $0x48] sm:$0xf] %vm678_vm4, %v3711_v32  ;;  %684 = vst.msk [vmem:[#allocation2 + $0x4c] sm:$0xf] %vm678_vm4, %v3714_v33 }
  0x65   : > { %685 = vst.msk [vmem:[#allocation2 + $0x50] sm:$0xf] %vm678_vm4, %v3717_v34  ;;  %686 = vst.msk [vmem:[#allocation2 + $0x54] sm:$0xf] %vm678_vm4, %v3720_v35 }
  0x66   : > { %687 = vst.msk [vmem:[#allocation2 + $0x58] sm:$0xf] %vm678_vm4, %v3723_v36  ;;  %688 = vst.msk [vmem:[#allocation2 + $0x5c] sm:$0xf] %vm678_vm4, %v3726_v37 }
  0x67   : > { %689 = vst.msk [vmem:[#allocation2 + $0x60] sm:$0xf] %vm678_vm4, %v3729_v38  ;;  %690 = vst.msk [vmem:[#allocation2 + $0x64] sm:$0xf] %vm678_vm4, %v3732_v39 }
  0x68   : > { %691 = vst.msk [vmem:[#allocation2 + $0x68] sm:$0xf] %vm678_vm4, %v3735_v40 }
  0x69   : > { %693 = vst.msk [vmem:[#allocation2 + $0x6c] sm:$0x7] %vm692_vm5, %v3738_v41 }
  0x6a PF: > { %p2977_p13 = scmp.ne.s32.totalorder %s5508_s12, 2 }
  0x6c   : > { %697 = sbr.rel (%p2977_p13) target bundleno = 122 (0x7a), region = 88 }
  0x71   : > { %vm699_vm6 = vcmask 60416   ;;  %vm713_vm7 = vcmask 59392  }
  0x72   : > { %700 = vst.msk [vmem:[#allocation2 + $0x70] sm:$0xf] %vm699_vm6, %v3699_v28  ;;  %701 = vst.msk [vmem:[#allocation2 + $0x74] sm:$0xf] %vm699_vm6, %v3702_v29 }
  0x73   : > { %702 = vst.msk [vmem:[#allocation2 + $0x78] sm:$0xf] %vm699_vm6, %v3705_v30  ;;  %703 = vst.msk [vmem:[#allocation2 + $0x7c] sm:$0xf] %vm699_vm6, %v3708_v31 }
  0x74   : > { %704 = vst.msk [vmem:[#allocation2 + $0x80] sm:$0xf] %vm699_vm6, %v3711_v32  ;;  %705 = vst.msk [vmem:[#allocation2 + $0x84] sm:$0xf] %vm699_vm6, %v3714_v33 }
  0x75   : > { %706 = vst.msk [vmem:[#allocation2 + $0x88] sm:$0xf] %vm699_vm6, %v3717_v34  ;;  %707 = vst.msk [vmem:[#allocation2 + $0x8c] sm:$0xf] %vm699_vm6, %v3720_v35 }
  0x76   : > { %708 = vst.msk [vmem:[#allocation2 + $0x90] sm:$0xf] %vm699_vm6, %v3723_v36  ;;  %709 = vst.msk [vmem:[#allocation2 + $0x94] sm:$0xf] %vm699_vm6, %v3726_v37 }
  0x77   : > { %710 = vst.msk [vmem:[#allocation2 + $0x98] sm:$0xf] %vm699_vm6, %v3729_v38  ;;  %711 = vst.msk [vmem:[#allocation2 + $0x9c] sm:$0xf] %vm699_vm6, %v3732_v39 }
  0x78   : > { %712 = vst.msk [vmem:[#allocation2 + $0xa0] sm:$0xf] %vm699_vm6, %v3735_v40 }
  0x79   : > { %714 = vst.msk [vmem:[#allocation2 + $0xa4] sm:$0x7] %vm713_vm7, %v3738_v41 }
  0x7a PF: > { %s1152_s26 = sadd.s32 1, %s3478_s25  ;;  %s716_s29 = ssub.s32 0, %s3478_s25  ;;  %vm827_vm8 = vcmask 1046528   ;;  %vm942_vm9 = vcmask 1045504   ;;  %vm5466_vm10 = vcmask 1044480   ;;  %vm5467_vm14 = vcmask 1043456  }
  0x7b   : > { %s1154_s27 = ssub.s32 0, %s1152_s26  ;;  %s2978_s30 = smin.u32 %s3478_s25, %s716_s29  ;;  %vm772_vm11 = vsmask.f32 7424  ;;  %vm878_vm12 = vsmask.f32 6400  ;;  %vm3505_vm15 = vmmov 0  }
  0x7c   : > { %s2996_s28 = smin.u32 %s1154_s27, %s1152_s26  ;;  %p1153_p0 = scmp.lt.s32.totalorder %s1152_s26, 0  ;;  %vm989_vm13 = vsmask.f32 5376  ;;  %vm1055_vm0 = vcmask 64512   ;;  %vm1066_vm1 = vcmask 130048   ;;  %vm1077_vm2 = vcmask 195584  }
  0x7d   : > { %3412 = sdivrem.u32 %s2996_s28, 3  ;;  %p715_p2 = scmp.lt.s32.totalorder %s3478_s25, 0  ;;  %vm1088_vm3 = vcmask 261120   ;;  %vm1099_vm4 = vcmask 326656   ;;  %vm1110_vm5 = vcmask 392192   ;;  %vm1121_vm6 = vcmask 457728  }
  0x7e   : > { %3414 = sdivrem.u32 %s2978_s30, 3  ;;  %s3496_s25 = smov 24   ;;  %vm1132_vm7 = vcmask 523264  }
  0x7f   : > { %s3107_s18 = smul.u32 56, %s5508_s12  ;;  %s3497_s22 = smov 16  }
  0x80   : > { %s3498_s9 = smov 40   ;;  %s3499_s10 = smov 48  }
  0x81   : > { %s3797_s19 = scalar_lea.vmem [#allocation2], %s3107_s18  ;;  %s3500_s12 = smov 64  }
  0x82   : > { %s3501_s27 = smov 8   ;;  %s3502_s28 = smov 32  }
  0x83   : > { %s3503_s29 = smov 56   ;;  %s5489_s30 = sld [smem:[#allocation10_spill]] }
  0x84   : > { %s5490_s18 = sld [smem:[#allocation11_spill]] }
  0x86   : > { %s3413_s14 = spop.drf %3412 }
  0x87   : > { %s1158_s15 = ssub.s32 0, %s3413_s14  ;;  %s3794_s24 = spop.drf %3414 }
  0x88   : > { %s5510_s15 = smov (!%p1153_p0, %s1158_s15), %s3413_s14  ;;  %s720_s20 = ssub.s32 0, %s3794_s24 }
  0x89   : > { %p2998_p1 = scmp.lt.s32.totalorder %s5510_s15, 0  ;;  %s1164_s21 = sadd.s32 3, %s5510_s15 }
  0x8a   : > { %s5514_s20 = smov (!%p715_p2, %s720_s20), %s3794_s24 }
  0x8b   : > { %s5512_s21 = smov (!%p2998_p1, %s1164_s21), %s5510_s15  ;;  %p2980_p3 = scmp.lt.s32.totalorder %s5514_s20, 0 }
  0x8c   : > { %s3106_s16 = smul.u32 56, %s5512_s21  ;;  %s726_s0 = sadd.s32 3, %s5514_s20 }
  0x8d   : > { %s5516_s0 = smov (!%p2980_p3, %s726_s0), %s5514_s20 }
  0x8e   : > { %s3800_s17 = scalar_lea.vmem [#allocation2], %s3106_s16  ;;  %s3105_s11 = smul.u32 56, %s5516_s0 }
  0x8f   : > { %v1170_v42 = vld [vmem:[%s3800_s17 + $0x4] sm:$0xf]  ;;  %v1171_v43 = vld [vmem:[%s3800_s17 + $0x8] sm:$0xf]  ;;  %v1172_v44 = vld [vmem:[%s3800_s17 + $0xc] sm:$0xf] }
  0x90   : > { %v1173_v45 = vld [vmem:[%s3800_s17 + $0x10] sm:$0xf]  ;;  %v1174_v46 = vld [vmem:[%s3800_s17 + $0x14] sm:$0xf]  ;;  %v3807_v47 = vcombine.low %v1171_v43, %v1172_v44  ;;  %v3809_v48 = vcombine.low %v1170_v42, %v1171_v43  ;;  %v1169_v49 = vld [vmem:[%s3800_s17] sm:$0xf] }
  0x91   : > { %v3812_v50 = vcombine.low %v1172_v44, %v1173_v45  ;;  %v3814_v51 = vcombine.low %v1169_v49, %v1170_v42  ;;  %v1175_v52 = vld [vmem:[%s3800_s17 + $0x18] sm:$0xf]  ;;  %v1176_v53 = vld [vmem:[%s3800_s17 + $0x1c] sm:$0xf]  ;;  %v1177_v54 = vld [vmem:[%s3800_s17 + $0x20] sm:$0xf]  ;;  %v3824_v59 = vcombine.low %v1173_v45, %v1174_v46 }
  0x92   : > { %v1293_v55 = vrot.slane %v3809_v48, 1  ;;  %v1265_v56 = vrot.slane %v3807_v47, 1  ;;  %v1178_v57 = vld [vmem:[%s3800_s17 + $0x24] sm:$0xf]  ;;  %v3822_v58 = vcombine.low %v1175_v52, %v1176_v53  ;;  %v3831_v63 = vld [vmem:[%s3800_s17 + $0x28] sm:$0xf]  ;;  %v3841_v3 = vcombine.low %v1176_v53, %v1177_v54 }
  0x93   : > { %v1294_v60 = vrot.slane %v3812_v50, 1  ;;  %v1264_v61 = vrot.slane %v3814_v51, 1  ;;  %v3828_v62 = vcombine.low %v1177_v54, %v1178_v57  ;;  %v1377_v1 = vrot.slane %v3809_v48, 2  ;;  %v3868_v14 = vld [vmem:[%s3800_s17 + $0x2c] sm:$0xf]  ;;  %s3940_s26 = scalar_lea.vmem [#allocation2], %s3105_s11 }
  0x94   : > { %v1269_v0 = vrot.slane %v3822_v58, 1  ;;  %v1378_v2 = vrot.slane %v3812_v50, 2  ;;  %v3849_v7 = vcombine.low %v1178_v57, %v3831_v63  ;;  %v1402_v9 = vrot.slane %v3807_v47, 2  ;;  %s5491_s16 = sld [smem:[#allocation13_spill]] }
  0x95   : > { %v1295_v4 = vsel %vm827_vm8, %v1293_v55, %v1294_v60  ;;  %v1266_v5 = vsel %vm827_vm8, %v1264_v61, %v1265_v56  ;;  %v1271_v6 = vrot.slane %v3828_v62, 1  ;;  %v1298_v11 = vrot.slane %v3841_v3, 1 }
  0x96   : > { %1304 = vrot.lane.b32.xlu1 %v1295_v4, %s3496_s25  ;;  %1275 = vrot.lane.b32.xlu0 %v1266_v5, %s3497_s22  ;;  %v1379_v8 = vsel %vm942_vm9, %v1377_v1, %v1378_v2  ;;  %v1300_v12 = vrot.slane %v3849_v7, 1  ;;  %v1403_v13 = vrot.slane %v3824_v59, 2  ;;  %v1382_v15 = vrot.slane %v3841_v3, 2 }
  0x97   : > { %v1272_v10 = vsel %vm827_vm8, %v1269_v0, %v1271_v6  ;;  %v1384_v16 = vrot.slane %v3849_v7, 2  ;;  %v1466_v17 = vrot.slane %v3807_v47, 3  ;;  %v1467_v18 = vrot.slane %v3824_v59, 3 }
  0x98   : > { %v1267_v19 = vrot.slane %v3824_v59, 1  ;;  %v3884_v20 = vcombine.low %v3831_v63, %v3868_v14  ;;  %v3886_v21 = vcombine.low %v1174_v46, %v1175_v52  ;;  %v1301_v22 = vsel %vm827_vm8, %v1298_v11, %v1300_v12 }
  0x99   : > { %v1404_v23 = vsel %vm942_vm9, %v1402_v9, %v1403_v13  ;;  %v1213_v24 = vshll.u32 %v3814_v51, 16  ;;  %v1234_v25 = vshll.u32 %v3822_v58, 16  ;;  %v1385_v26 = vsel %vm942_vm9, %v1382_v15, %v1384_v16 }
  0x9a   : > { %1281 = vrot.lane.b32.xlu1 %v1272_v10, %s3497_s22  ;;  %1388 = vrot.lane.b32.xlu0 %v1379_v8, %s3498_s9  ;;  %v1315_v27 = vshrl.u32 %v3809_v48, 16  ;;  %v1318_v28 = vshll.u32 %v3809_v48, 16  ;;  %v1468_v29 = vsel %vm5466_vm10, %v1466_v17, %v1467_v18  ;;  %v1407_v30 = vrot.slane %v3828_v62, 2 }
  0x9b   : > { %v1323_v31 = vshrl.u32 %v3812_v50, 16  ;;  %v1326_v32 = vshll.u32 %v3812_v50, 16  ;;  %v1268_v33 = vsel %vm827_vm8, %v1265_v56, %v1267_v19  ;;  %v1409_v34 = vrot.slane %v3884_v20, 2 }
  0x9c   : > { %v1296_v35 = vrot.slane %v3886_v21, 1  ;;  %v1211_v36 = vshrl.u32 %v3814_v51, 16  ;;  %v1215_v37 = vrot.slane %v1213_v24, 1  ;;  %v1218_v38 = vshll.u32 %v3807_v47, 16 }
  0x9d   : > { %v3923_v39 = vrot.slane %v1234_v25, 1  ;;  %v1238_v40 = vshrl.u32 %v3822_v58, 16  ;;  %v1317_v41 = vrot.slane %v1315_v27, 1  ;;  %v1320_v42 = vrot.slane %v1318_v28, 2 }
  0x9e   : > { %1310 = vrot.lane.b32.xlu1 %v1301_v22, %s3496_s25  ;;  %1413 = vrot.lane.b32.xlu0 %v1404_v23, %s3499_s10  ;;  %v1341_v43 = vshrl.u32 %v3841_v3, 16  ;;  %v1344_v44 = vshll.u32 %v3841_v3, 16  ;;  %v1325_v45 = vrot.slane %v1323_v31, 1  ;;  %v1328_v46 = vrot.slane %v1326_v32, 2 }
  0x9f   : > { %v1350_v48 = vshrl.u32 %v3849_v7, 16  ;;  %v1353_v49 = vshll.u32 %v3849_v7, 16  ;;  %v1410_v52 = vsel %vm942_vm9, %v1407_v30, %v1409_v34  ;;  %v1222_v53 = vshrl.u32 %v3807_v47, 16  ;;  %v1809_v7 = vld [vmem:[%s3797_s19 + $0x4] sm:$0xf] }
  0xa0   : > { %v1226_v54 = vshll.u32 %v3824_v59, 16  ;;  %v1230_v55 = vshrl.u32 %v3824_v59, 16  ;;  %v1297_v56 = vsel %vm827_vm8, %v1294_v60, %v1296_v35  ;;  %v1216_v57 = vor.u32 %v1215_v37, %v1211_v36 }
  0xa1   : > { %v1220_v61 = vrot.slane %v1218_v38, 1  ;;  %v1242_v1 = vshll.u32 %v3828_v62, 16  ;;  %v1240_v4 = vor.u32 %v1238_v40, %v3923_v39  ;;  %v1321_v5 = vor.u32 %v1320_v42, %v1317_v41 }
  0xa2   : > { %1394 = vrot.lane.b32.xlu1 %v1385_v26, %s3498_s9  ;;  %1477 = vrot.lane.b32.xlu0 %v1468_v29, %s3500_s12  ;;  %v1343_v8 = vrot.slane %v1341_v43, 1  ;;  %v1346_v9 = vrot.slane %v1344_v44, 2  ;;  %v1329_v10 = vor.u32 %v1328_v46, %v1325_v45  ;;  %v1352_v17 = vrot.slane %v1350_v48, 1 }
  0xa3   : > { %v1355_v22 = vrot.slane %v1353_v49, 2  ;;  %v1424_v23 = vrot.slane %v1218_v38, 3  ;;  %v1423_v60 = vrot.slane %v1222_v53, 2  ;;  %v1426_v24 = vrot.slane %v1230_v55, 2 }
  0xa4   : > { %v1427_v26 = vrot.slane %v1226_v54, 3  ;;  %v1246_v27 = vshrl.u32 %v3828_v62, 16  ;;  %v1221_v28 = vsel %vm772_vm11, %v1216_v57, %v1220_v61  ;;  %v1244_v29 = vrot.slane %v1242_v1, 1 }
  0xa5   : > { %v1439_v31 = vshrl.u32 %v3884_v20, 16  ;;  %v1442_v32 = vshll.u32 %v3884_v20, 16  ;;  %v1330_v36 = vsel %vm878_vm12, %v1321_v5, %v1329_v10  ;;  %v3963_v37 = vor.u32 %v1346_v9, %v1343_v8 }
  0xa6   : > { %1277 = vrot.lane.b32.xlu1 %v1268_v33, %s3497_s22  ;;  %1419 = vrot.lane.b32.xlu0 %v1410_v52, %s3499_s10  ;;  %v1245_v33 = vsel %vm772_vm11, %v1240_v4, %v1244_v29  ;;  %v3965_v38 = vor.u32 %v1355_v22, %v1352_v17  ;;  %v1425_v41 = vor.u32 %v1424_v23, %v1423_v60  ;;  %v1434_v43 = vrot.slane %v1246_v27, 2 }
  0xa7   : > { %v1428_v42 = vor.u32 %v1427_v26, %v1426_v24  ;;  %v1435_v44 = vrot.slane %v1242_v1, 3  ;;  %v1441_v45 = vrot.slane %v1439_v31, 2  ;;  %v1444_v46 = vrot.slane %v1442_v32, 3 }
  0xa8   : > { %v1332_v48 = vshrl.u32 %v3886_v21, 16  ;;  %v1335_v49 = vshll.u32 %v3886_v21, 16  ;;  %v1357_v52 = vsel %vm878_vm12, %v3963_v37, %v3965_v38  ;;  %v1224_v57 = vor.u32 %v1222_v53, %v1220_v61 }
  0xa9   : > { %v3975_v4 = vor.u32 %v1435_v44, %v1434_v43  ;;  %v3977_v1 = vor.u32 %v1444_v46, %v1441_v45  ;;  %v1228_v9 = vrot.slane %v1226_v54, 1  ;;  %v1471_v53 = vrot.slane %v3828_v62, 3 }
  0xaa   : > { %1306 = vrot.lane.b32.xlu1 %v1297_v56, %s3496_s25  ;;  %1254 = vrot.lane.b32.xlu0 %v1221_v28, %s3501_s27  ;;  %v1429_v56 = vsel %vm989_vm13, %v1425_v41, %v1428_v42  ;;  %v1334_v5 = vrot.slane %v1332_v48, 1  ;;  %v1337_v8 = vrot.slane %v1335_v49, 2  ;;  %v1473_v61 = vrot.slane %v3884_v20, 3  ;;  %v3383_v49 = vld [vmem:[%s5453_s4 + $0x44] ss:$0 sps:$4 sm:$0xff]  }
  0xab   : > { %v1229_v17 = vsel %vm772_vm11, %v1224_v57, %v1228_v9  ;;  %v1446_v22 = vsel %vm989_vm13, %v3975_v4, %v3977_v1  ;;  %v3005_v60 = vcombine.low %v3831_v63, %v3831_v63  ;;  %v1405_v54 = vrot.slane %v3822_v58, 2 }
  0xac   : > { %v3985_v23 = vor.u32 %v1337_v8, %v1334_v5  ;;  %v1380_v24 = vrot.slane %v3886_v21, 2  ;;  %v1474_v28 = vsel %vm5466_vm10, %v1471_v53, %v1473_v61  ;;  %v1430_v31 = vrot.slane %v1238_v40, 2  ;;  %v3384_v5 = vld [vmem:[%s5453_s4 + $0x3c] sm:$0xff]  }
  0xad   : > { %v1431_v32 = vrot.slane %v1234_v25, 3  ;;  %v1250_v63 = vshll.u32 %v3005_v60, 16  ;;  %v1248_v25 = vor.u32 %v1246_v27, %v1244_v29  ;;  %v1469_v43 = vrot.slane %v3822_v58, 3 }
  0xae   : > { %1260 = vrot.lane.b32.xlu1 %v1245_v33, %s3501_s27  ;;  %1367 = vrot.lane.b32.xlu0 %v1330_v36, %s3502_s28  ;;  %v1339_v26 = vsel %vm878_vm12, %v1329_v10, %v3985_v23  ;;  %v1406_v10 = vsel %vm942_vm9, %v1403_v13, %v1405_v54  ;;  %v1381_v40 = vsel %vm942_vm9, %v1378_v2, %v1380_v24  ;;  %v1273_v13 = vrot.slane %v3005_v60, 1  ;;  %v732_v60 = vld [vmem:[%s3940_s26 + $0x4] sm:$0xf] }
  0xaf   : > { %v4018_v33 = vor.u32 %v1431_v32, %v1430_v31  ;;  %v3011_v36 = vcombine.low %v3868_v14, %v3868_v14  ;;  %v1252_v41 = vrot.slane %v1250_v63, 1  ;;  %v1470_v14 = vsel %vm5466_vm10, %v1467_v18, %v1469_v43  ;;  %v733_v63 = vld [vmem:[%s3940_s26 + $0x8] sm:$0xf] }
  0xb0   : > { %v1232_v27 = vor.u32 %v1230_v55, %v1228_v9  ;;  %v1274_v29 = vsel %vm827_vm8, %v1271_v6, %v1273_v13  ;;  %v3504_v18 = vmov 0.0   ;;  %v1617_v57 = vsel %vm5467_vm14, %v3383_v49, 0  ;;  %v1810_v13 = vld [vmem:[%s3797_s19 + $0x8] sm:$0xf] }
  0xb1   : > { %v1433_v44 = vsel %vm989_vm13, %v1428_v42, %v4018_v33  ;;  %v1253_v50 = vsel %vm772_vm11, %v1248_v25, %v1252_v41  ;;  %v1359_v2 = vshrl.u32 %v3011_v36, 16  ;;  %v1362_v45 = vshll.u32 %v3011_v36, 16  ;;  %3150 = vmatprep.subr.bf16.mxu0 %v3504_v18  ;;  %3284 = vmatprep.subr.bf16.mxu1 %v3504_v18 }
  0xb2   : > { %1373 = vrot.lane.b32.xlu1 %v1357_v52, %s3502_s28  ;;  %1456 = vrot.lane.b32.xlu0 %v1429_v56, %s3503_s29  ;;  %v1302_v42 = vrot.slane %v3011_v36, 1  ;;  %v1237_v55 = vsel %vm772_vm11, %v1232_v27, %v3923_v39  ;;  %v4053_v56 = vld [vmem:[%s3800_s17 + $0x30] ss:$0 sps:$4 sm:$0xff]   ;;  %v1386_v8 = vrot.slane %v3011_v36, 2  ;;  %v4143_v27 = vcombine.low %v732_v60, %v733_v63  ;;  %s5487_s17 = sld [smem:[#allocation12_spill]] }
  0xb3   : > { %v1361_v46 = vrot.slane %v1359_v2, 1  ;;  %v1364_v48 = vrot.slane %v1362_v45, 2  ;;  %3151 = vmatpush3.bf16.msra.mxu0 %v1617_v57  ;;  %3289 = vmatpush3.bf16.msra.mxu1 %v1617_v57  ;;  %v1448_v9 = vshrl.u32 %v4053_v56, 16  ;;  %v1475_v2 = vrot.slane %v4053_v56, 3 }
  0xb4   : > { %v1303_v6 = vsel %vm827_vm8, %v1300_v12, %v1302_v42  ;;  %v1270_v12 = vsel %vm827_vm8, %v1267_v19, %v1269_v0  ;;  %3152 = vmatprep.subr.bf16.mxu0 %v3504_v18  ;;  %3285 = vmatprep.subr.bf16.mxu1 %v3504_v18  ;;  %v3385_v0 = vld [vmem:[%s5453_s4 + $0x34] sm:$0xff]   ;;  %v1299_v19 = vsel %vm827_vm8, %v1296_v35, %v1298_v11  ;;  %v1808_v11 = vld [vmem:[%s3797_s19] sm:$0xf]  ;;  %v3386_v35 = vld [vmem:[%s5453_s4 + $0x2c] sm:$0xff]   ;;  %v883_v57 = vshll.u32 %v4143_v27, 16 }
  0xb5   : > { %v1365_v52 = vor.u32 %v1364_v48, %v1361_v46  ;;  %3160 = vmatprep.mubr.msk.bf16.mxu0 %vm3505_vm15, %v3504_v18  ;;  %3172 = vmatprep.mubr.msk.bf16.mxu1 %vm3505_vm15, %v3504_v18  ;;  %v4118_v41 = vcombine.low %v1808_v11, %v1809_v7 }
  0xb6   : > { %1256 = vrot.lane.b32.xlu1 %v1229_v17, %s3501_s27  ;;  %1462 = vrot.lane.b32.xlu0 %v1446_v22, %s3503_s29  ;;  %v1451_v17 = vshll.u32 %v4053_v56, 16  ;;  %v731_v22 = vld [vmem:[%s3940_s26] sm:$0xf] }
  0xb7   : > { %v1366_v39 = vsel %vm878_vm12, %v3965_v38, %v1365_v52  ;;  %3153 = vmatpush3.bf16.msra.mxu0 %v3384_v5  ;;  %3290 = vmatpush3.bf16.msra.mxu1 %v3384_v5  ;;  %v1411_v38 = vrot.slane %v4053_v56, 2  ;;  %v4090_v32 = vcombine.low %v731_v22, %v732_v60  ;;  %v1852_v21 = vshll.u32 %v4118_v41, 16  ;;  %v1812_v52 = vld [vmem:[%s3797_s19 + $0x10] sm:$0xf] }
  0xb8   : > { %3154 = vmatprep.subr.bf16.mxu0 %v3504_v18  ;;  %3286 = vmatprep.subr.bf16.mxu1 %v3504_v18  ;;  %v1453_v31 = vrot.slane %v1451_v17, 3  ;;  %v1850_v20 = vshrl.u32 %v4118_v41, 16  ;;  %v857_v22 = vrot.slane %v4143_v27, 1 }
  0xb9   : > { %v776_v36 = vshll.u32 %v4090_v32, 16  ;;  %v774_v45 = vshrl.u32 %v4090_v32, 16 }
  0xba   : > { %1369 = vrot.lane.b32.xlu1 %v1339_v26, %s3502_s28  ;;  %1483 = vrot.lane.b32.xlu0 %v1474_v28, %s3500_s12  ;;  %v1387_v26 = vsel %vm942_vm9, %v1384_v16, %v1386_v8  ;;  %v1450_v28 = vrot.slane %v1448_v9, 2  ;;  %v1412_v16 = vsel %vm942_vm9, %v1409_v34, %v1411_v38  ;;  %v1472_v9 = vsel %vm5466_vm10, %v1469_v43, %v1471_v53 }
  0xbb   : > { %3155 = vmatpush3.bf16.msra.mxu0 %v3385_v0  ;;  %3291 = vmatpush3.bf16.msra.mxu1 %v3385_v0 }
  0xbc   : > { %3156 = vmatprep.subr.bf16.mxu0 %v3504_v18  ;;  %3287 = vmatprep.subr.bf16.mxu1 %v3504_v18  ;;  %v1454_v25 = vor.u32 %v1453_v31, %v1450_v28  ;;  %v1903_v28 = vrot.slane %v4118_v41, 1 }
  0xbe   : > { %1415 = vrot.lane.b32.xlu1 %v1406_v10, %s3499_s10  ;;  %1390 = vrot.lane.b32.xlu0 %v1381_v40, %s3498_s9  ;;  %v734_v10 = vld [vmem:[%s3940_s26 + $0xc] sm:$0xf]  ;;  %v1348_v40 = vsel %vm878_vm12, %v3985_v23, %v3963_v37  ;;  %v3387_v37 = vld [vmem:[%s5453_s4 + $0x24] sm:$0xff]   ;;  %v1383_v23 = vsel %vm942_vm9, %v1380_v24, %v1382_v15 }
  0xbf   : > { %v4116_v34 = vcombine.low %v733_v63, %v734_v10  ;;  %3157 = vmatpush3.bf16.msra.mxu0 %v3386_v35  ;;  %3292 = vmatpush3.bf16.msra.mxu1 %v3386_v35  ;;  %v735_v24 = vld [vmem:[%s3940_s26 + $0x10] sm:$0xf] }
  0xc0   : > { %3158 = vmatprep.subr.bf16.mxu0 %v3504_v18  ;;  %3288 = vmatprep.subr.bf16.mxu1 %v3504_v18  ;;  %v4155_v46 = vcombine.low %v734_v10, %v735_v24  ;;  %v4208_v10 = vld [vmem:[%s3940_s26 + $0x14] sm:$0xf] }
  0xc1   : > { %v781_v3 = vshll.u32 %v4116_v34, 16 }
  0xc2   : > { %1458 = vrot.lane.b32.xlu1 %v1433_v44, %s3503_s29  ;;  %1262 = vrot.lane.b32.xlu0 %v1253_v50, %s3501_s27  ;;  %v1811_v44 = vld [vmem:[%s3797_s19 + $0xc] sm:$0xf]  ;;  %v1455_v50 = vsel %vm989_vm13, %v3977_v1, %v1454_v25  ;;  %v1476_v1 = vsel %vm5466_vm10, %v1473_v61, %v1475_v2  ;;  %v1854_v61 = vrot.slane %v1852_v21, 1  ;;  %v888_v5 = vshrl.u32 %v4155_v46, 16 }
  0xc3   : > { %v4139_v15 = vcombine.low %v1810_v13, %v1811_v44  ;;  %3159 = vmatpush3.bf16.msra.mxu0 %v3387_v37  ;;  %3293 = vmatpush3.bf16.msra.mxu1 %v3387_v37  ;;  %v4161_v48 = vrot.slane %v781_v3, 1  ;;  %v4185_v8 = vcombine.low %v1811_v44, %v1812_v52  ;;  %v858_v60 = vrot.slane %v4155_v46, 1  ;;  %v4226_v44 = vld [vmem:[%s3797_s19 + $0x14] sm:$0xf] }
  0xc4   : > { %3180 = vmatprep.subr.bf16.mxu1 %v3504_v18  ;;  %3210 = vmatprep.subr.bf16.mxu0 %v3504_v18  ;;  %v890_v38 = vrot.slane %v888_v5, 1  ;;  %v944_v21 = vrot.slane %v4155_v46, 2 }
  0xc5   : > { %v1857_v49 = vshll.u32 %v4139_v15, 16  ;;  %v1904_v53 = vrot.slane %v4139_v15, 1  ;;  %v1962_v35 = vshrl.u32 %v4185_v8, 16  ;;  %v1965_v63 = vshll.u32 %v4185_v8, 16 }
  0xc6   : > { %1479 = vrot.lane.b32.xlu1 %v1470_v14, %s3500_s12  ;;  %1283 = vrot.lane.b32.xlu0 %v1274_v29, %s3497_s22  ;;  %v778_v14 = vrot.slane %v776_v36, 1  ;;  %v1408_v29 = vsel %vm942_vm9, %v1405_v54, %v1407_v30  ;;  %v1437_v30 = vsel %vm989_vm13, %v4018_v33, %v3975_v4  ;;  %v828_v54 = vrot.slane %v4090_v32, 1 }
  0xc7   : > { %v4179_v4 = vcombine.low %v1809_v7, %v1810_v13  ;;  %v1855_v33 = vor.u32 %v1854_v61, %v1850_v20  ;;  %v859_v7 = vsel %vm827_vm8, %v857_v22, %v858_v60  ;;  %v1905_v25 = vsel %vm827_vm8, %v1903_v28, %v1904_v53 }
  0xc8   : > { %v779_v42 = vor.u32 %v778_v14, %v774_v45  ;;  %v1933_v37 = vrot.slane %v4185_v8, 1  ;;  %v4223_v13 = vcombine.low %v735_v24, %v4208_v10  ;;  %v1964_v2 = vrot.slane %v1962_v35, 1 }
  0xc9   : > { %v1954_v43 = vshrl.u32 %v4179_v4, 16  ;;  %v1957_v11 = vshll.u32 %v4179_v4, 16  ;;  %v1932_v36 = vrot.slane %v4179_v4, 1  ;;  %v1967_v45 = vrot.slane %v1965_v63, 2 }
  0xca   : > { %1312 = vrot.lane.b32.xlu1 %v1303_v6, %s3496_s25  ;;  %1258 = vrot.lane.b32.xlu0 %v1237_v55, %s3501_s27  ;;  %v829_v6 = vrot.slane %v4116_v34, 1  ;;  %v880_v55 = vshrl.u32 %v4143_v27, 16  ;;  %v784_v56 = vsel %vm772_vm11, %v779_v42, %v4161_v48  ;;  %v943_v14 = vrot.slane %v4143_v27, 2 }
  0xcb   : > { %v793_v42 = vshrl.u32 %v4223_v13, 16  ;;  %v4237_v24 = vcombine.low %v1812_v52, %v4226_v44  ;;  %v1934_v27 = vsel %vm827_vm8, %v1932_v36, %v1933_v37  ;;  %v4242_v61 = vor.u32 %v1967_v45, %v1964_v2 }
  0xcc   : > { %v830_v17 = vsel %vm827_vm8, %v828_v54, %v829_v6  ;;  %v882_v0 = vrot.slane %v880_v55, 1  ;;  %v945_v54 = vsel %vm942_vm9, %v943_v14, %v944_v21  ;;  %v968_v55 = vrot.slane %v4116_v34, 2 }
  0xcd   : > { %v991_v52 = vrot.slane %v781_v3, 3  ;;  %v993_v5 = vrot.slane %v793_v42, 2  ;;  %v1861_v22 = vshrl.u32 %v4139_v15, 16  ;;  %v1869_v3 = vshrl.u32 %v4237_v24, 16 }
  0xce   : > { %1375 = vrot.lane.b32.xlu1 %v1366_v39, %s3502_s28  ;;  %1279 = vrot.lane.b32.xlu0 %v1270_v12, %s3497_s22  ;;  %v891_v12 = vshll.u32 %v4155_v46, 16  ;;  %v4183_v39 = vrot.slane %v1857_v49, 1  ;;  %v2041_v28 = vrot.slane %v4139_v15, 2 }
  0xcf   : > { %v2065_v35 = vrot.slane %v1869_v3, 2 }
  0xd0   : > { %v1860_v31 = vsel %vm772_vm11, %v1855_v33, %v4183_v39  ;;  %v2016_v33 = vrot.slane %v4179_v4, 2 }
  0xd2   : > { %1396 = vrot.lane.b32.xlu1 %v1387_v26, %s3498_s9  ;;  %1308 = vrot.lane.b32.xlu0 %v1299_v19, %s3496_s25  ;;  %v885_v19 = vrot.slane %v883_v57, 2  ;;  %v893_v26 = vrot.slane %v891_v12, 2 }
  0xd6   : > { %1421 = vrot.lane.b32.xlu1 %v1412_v16, %s3499_s10  ;;  %1371 = vrot.lane.b32.xlu0 %v1348_v40, %s3502_s28  ;;  %v886_v16 = vor.u32 %v885_v19, %v882_v0  ;;  %v4213_v40 = vor.u32 %v893_v26, %v890_v38  ;;  %v1865_v0 = vshll.u32 %v4237_v24, 16 }
  0xd8   : > { %v2066_v63 = vrot.slane %v1865_v0, 3 }
  0xda   : > { %1464 = vrot.lane.b32.xlu1 %v1455_v50, %s3503_s29  ;;  %1392 = vrot.lane.b32.xlu0 %v1383_v23, %s3498_s9  ;;  %v1956_v23 = vrot.slane %v1954_v43, 1  ;;  %v1959_v50 = vrot.slane %v1957_v11, 2  ;;  %v2042_v43 = vrot.slane %v4237_v24, 2  ;;  %v2063_v11 = vrot.slane %v1857_v49, 3 }
  0xdc   : > { %v1960_v20 = vor.u32 %v1959_v50, %v1956_v23  ;;  %v2043_v49 = vsel %vm942_vm9, %v2041_v28, %v2042_v43  ;;  %v4288_v23 = vor.u32 %v2066_v63, %v2065_v35  ;;  %v737_v50 = vld [vmem:[%s3940_s26 + $0x18] sm:$0xf] }
  0xdd   : > { %v4296_v14 = vcombine.low %v4208_v10, %v737_v50  ;;  %v831_v10 = vrot.slane %v4223_v13, 1 }
  0xde   : > { %1485 = vrot.lane.b32.xlu1 %v1476_v1, %s3500_s12  ;;  %1417 = vrot.lane.b32.xlu0 %v1408_v29, %s3499_s10  ;;  %v895_v1 = vsel %vm878_vm12, %v886_v16, %v4213_v40  ;;  %v785_v29 = vshrl.u32 %v4116_v34, 16  ;;  %v1034_v16 = vrot.slane %v4116_v34, 3 }
  0xe0   : > { %v990_v57 = vrot.slane %v785_v29, 2  ;;  %v787_v45 = vor.u32 %v785_v29, %v4161_v48  ;;  %v897_v29 = vshrl.u32 %v4296_v14, 16 }
  0xe2   : > { %1460 = vrot.lane.b32.xlu1 %v1437_v30, %s3503_s29  ;;  %817 = vrot.lane.b32.xlu0 %v784_v56, %s3501_s27  ;;  %v789_v30 = vshll.u32 %v4223_v13, 16  ;;  %v969_v56 = vrot.slane %v4223_v13, 2  ;;  %v992_v38 = vor.u32 %v991_v52, %v990_v57  ;;  %v900_v57 = vshll.u32 %v4296_v14, 16 }
  0xe3   : > { %v1863_v52 = vor.u32 %v1861_v22, %v4183_v39 }
  0xe4   : > { %v994_v12 = vrot.slane %v789_v30, 3  ;;  %v970_v19 = vsel %vm942_vm9, %v968_v55, %v969_v56  ;;  %v1814_v55 = vld [vmem:[%s3797_s19 + $0x18] sm:$0xf] }
  0xe6   : > { %1481 = vrot.lane.b32.xlu1 %v1472_v9, %s3500_s12  ;;  %839 = vrot.lane.b32.xlu0 %v830_v17, %s3497_s22  ;;  %v2017_v9 = vrot.slane %v4185_v8, 2  ;;  %v1969_v17 = vsel %vm878_vm12, %v1960_v20, %v4242_v61  ;;  %v4266_v26 = vor.u32 %v994_v12, %v993_v5  ;;  %v2105_v20 = vrot.slane %v4139_v15, 3 }
  0xe7   : > { %v4318_v5 = vrot.slane %v1865_v0, 1  ;;  %v4321_v12 = vcombine.low %v4226_v44, %v1814_v55  ;;  %v1906_v44 = vrot.slane %v4237_v24, 1 }
  0xe8   : > { %v2018_v4 = vsel %vm942_vm9, %v2016_v33, %v2017_v9  ;;  %v832_v33 = vsel %vm827_vm8, %v829_v6, %v831_v10 }
  0xe9   : > { %v1868_v39 = vsel %vm772_vm11, %v1863_v52, %v4318_v5  ;;  %v1971_v0 = vshrl.u32 %v4321_v12, 16  ;;  %v1974_v6 = vshll.u32 %v4321_v12, 16  ;;  %v1907_v63 = vsel %vm827_vm8, %v1904_v53, %v1906_v44 }
  0xea   : > { %1893 = vrot.lane.b32.xlu1 %v1860_v31, %s3501_s27  ;;  %868 = vrot.lane.b32.xlu0 %v859_v7, %s3496_s25  ;;  %v2062_v31 = vrot.slane %v1861_v22, 2  ;;  %v996_v7 = vsel %vm989_vm13, %v992_v38, %v4266_v26  ;;  %v902_v38 = vrot.slane %v900_v57, 2  ;;  %v4334_v22 = vld [vmem:[%s3940_s26 + $0x1c] sm:$0xf] }
  0xeb   : > { %v4352_v35 = vcombine.low %v737_v50, %v4334_v22 }
  0xec   : > { %v2064_v36 = vor.u32 %v2063_v11, %v2062_v31 }
  0xee   : > { %1914 = vrot.lane.b32.xlu1 %v1905_v25, %s3497_s22  ;;  %932 = vrot.lane.b32.xlu0 %v895_v1, %s3502_s28  ;;  %v1035_v25 = vrot.slane %v4223_v13, 3  ;;  %v2068_v1 = vsel %vm989_vm13, %v2064_v36, %v4288_v23 }
  0xf0   : > { %v1036_v2 = vsel %vm5466_vm10, %v1034_v16, %v1035_v25  ;;  %v1973_v16 = vrot.slane %v1971_v0, 1 }
  0xf2   : > { %1943 = vrot.lane.b32.xlu1 %v1934_v27, %s3496_s25  ;;  %954 = vrot.lane.b32.xlu0 %v945_v54, %s3498_s9  ;;  %v4302_v27 = vrot.slane %v789_v30, 1  ;;  %v2106_v54 = vrot.slane %v4237_v24, 3 }
  0xf4   : > { %v792_v48 = vsel %vm772_vm11, %v787_v45, %v4302_v27  ;;  %v2107_v30 = vsel %vm5466_vm10, %v2105_v20, %v2106_v54  ;;  %v946_v45 = vrot.slane %v4296_v14, 2 }
  0xf6   : > { %2006 = vrot.lane.b32.xlu1 %v1969_v17, %s3502_s28  ;;  %979 = vrot.lane.b32.xlu0 %v970_v19, %s3499_s10  ;;  %v860_v17 = vrot.slane %v4296_v14, 1  ;;  %v899_v19 = vrot.slane %v897_v29, 1 }
  0xf8   : > { %v861_v31 = vsel %vm827_vm8, %v858_v60, %v860_v17  ;;  %v4348_v11 = vor.u32 %v902_v38, %v899_v19  ;;  %v2019_v19 = vrot.slane %v4321_v12, 2 }
  0xfa   : > { %2027 = vrot.lane.b32.xlu1 %v2018_v4, %s3498_s9  ;;  %1023 = vrot.lane.b32.xlu0 %v996_v7, %s3503_s29  ;;  %v1935_v7 = vrot.slane %v4321_v12, 1  ;;  %v904_v50 = vsel %vm878_vm12, %v4213_v40, %v4348_v11  ;;  %v797_v40 = vshll.u32 %v4352_v35, 16 }
  0xfc   : > { %v1936_v20 = vsel %vm827_vm8, %v1933_v37, %v1935_v7  ;;  %v998_v37 = vrot.slane %v797_v40, 3 }
  0xfe   : > { %2052 = vrot.lane.b32.xlu1 %v2043_v49, %s3499_s10  ;;  %1045 = vrot.lane.b32.xlu0 %v1036_v2, %s3500_s12  ;;  %v1976_v49 = vrot.slane %v1974_v6, 2  ;;  %v4366_v2 = vld [vmem:[%s3797_s19 + $0x1c] sm:$0xf] }
  0xff   : > { %v4376_v53 = vcombine.low %v1814_v55, %v4366_v2  ;;  %v947_v55 = vsel %vm942_vm9, %v944_v21, %v946_v45 }
 0x101   : > { %v1873_v46 = vshll.u32 %v4376_v53, 16  ;;  %v1877_v21 = vshrl.u32 %v4376_v53, 16 }
 0x102   : > { %2095 = vrot.lane.b32.xlu1 %v2068_v1, %s3503_s29  ;;  %819 = vrot.lane.b32.xlu0 %v792_v48, %s3501_s27  ;;  %v801_v1 = vshrl.u32 %v4352_v35, 16  ;;  %v4383_v48 = vor.u32 %v1976_v49, %v1973_v16 }
 0x103   : > { %v2070_v16 = vrot.slane %v1873_v46, 3 }
 0x104   : > { %v997_v52 = vrot.slane %v801_v1, 2 }
 0x106   : > { %2116 = vrot.lane.b32.xlu1 %v2107_v30, %s3500_s12  ;;  %841 = vrot.lane.b32.xlu0 %v832_v33, %s3497_s22  ;;  %v971_v30 = vrot.slane %v4352_v35, 2  ;;  %v1978_v33 = vsel %vm878_vm12, %v4242_v61, %v4383_v48  ;;  %v4415_v6 = vor.u32 %v998_v37, %v997_v52  ;;  %v2020_v61 = vsel %vm942_vm9, %v2017_v9, %v2019_v19 }
 0x108   : > { %v4339_v4 = vpop.permute.xlu1 %1304  ;;  %v4341_v28 = vpop.permute.xlu0 %1275  ;;  %v972_v0 = vsel %vm942_vm9, %v969_v56, %v971_v30 }
 0x10a   : > { %1895 = vrot.lane.b32.xlu1 %v1868_v39, %s3501_s27  ;;  %870 = vrot.lane.b32.xlu0 %v861_v31, %s3496_s25  ;;  %v2044_v31 = vrot.slane %v4376_v53, 2 }
 0x10c   : > { %v4361_v60 = vpop.permute.xlu1 %1281  ;;  %v4363_v36 = vpop.permute.xlu0 %1388  ;;  %v2045_v8 = vsel %vm942_vm9, %v2042_v43, %v2044_v31  ;;  %v2108_v43 = vrot.slane %v4376_v53, 3 }
 0x10e   : > { %1916 = vrot.lane.b32.xlu1 %v1907_v63, %s3497_s22  ;;  %934 = vrot.lane.b32.xlu0 %v904_v50, %s3502_s28  ;;  %v2069_v63 = vrot.slane %v1877_v21, 2  ;;  %v1000_v50 = vsel %vm989_vm13, %v4266_v26, %v4415_v6  ;;  %v795_v26 = vor.u32 %v793_v42, %v4302_v27 }
 0x110   : > { %v4386_v29 = vpop.permute.xlu1 %1310  ;;  %v4388_v57 = vpop.permute.xlu0 %1413  ;;  %v4442_v9 = vor.u32 %v2070_v16, %v2069_v63 }
 0x112   : > { %1945 = vrot.lane.b32.xlu1 %v1936_v20, %s3496_s25  ;;  %956 = vrot.lane.b32.xlu0 %v947_v55, %s3498_s9  ;;  %v1037_v20 = vrot.slane %v4352_v35, 3  ;;  %v2072_v27 = vsel %vm989_vm13, %v4288_v23, %v4442_v9  ;;  %v2109_v23 = vsel %vm5466_vm10, %v2106_v54, %v2108_v43 }
 0x114   : > { %v4406_v38 = vpop.permute.xlu1 %1394  ;;  %v4408_v39 = vpop.permute.xlu0 %1477 }
 0x116   : > { %2008 = vrot.lane.b32.xlu1 %v1978_v33, %s3502_s28  ;;  %981 = vrot.lane.b32.xlu0 %v972_v0, %s3499_s10  ;;  %v1038_v33 = vsel %vm5466_vm10, %v1035_v25, %v1037_v20  ;;  %v4458_v0 = vld [vmem:[%s3940_s26 + $0x20] sm:$0xf]  ;;  %vm1604_vm10 = vcmask 588800  }
 0x117   : > { %v4468_v42 = vcombine.low %v4334_v22, %v4458_v0  ;;  %v4479_v22 = vld [vmem:[%s3797_s19 + $0x20] sm:$0xf] }
 0x118   : > { %v4427_v49 = vpop.permute.xlu1 %1277  ;;  %v4429_v56 = vpop.permute.xlu0 %1419 }
 0x119   : > { %v906_v54 = vshrl.u32 %v4468_v42, 16 }
 0x11a   : > { %2029 = vrot.lane.b32.xlu1 %v2020_v61, %s3498_s9  ;;  %1025 = vrot.lane.b32.xlu0 %v1000_v50, %s3503_s29 }
 0x11c   : > { %v4444_v55 = vpop.permute.xlu1 %1306  ;;  %v1255_v52 = vpop.permute.xlu0 %1254 }
 0x11d   : > { %v1488_v37 = vsel %vm1055_vm0, %v3814_v51, %v1255_v52  ;;  %v4464_v51 = vrot.slane %v797_v40, 1  ;;  %v833_v40 = vrot.slane %v4352_v35, 1  ;;  %v3400_v52 = vld [vmem:[%s5453_s4 + $0x68] ss:$0 sps:$4 sm:$0xff]  }
 0x11e   : > { %v1498_v61 = vsel %vm1066_vm1, %v1488_v37, %v4341_v28  ;;  %2054 = vrot.lane.b32.xlu1 %v2045_v8, %s3499_s10  ;;  %1047 = vrot.lane.b32.xlu0 %v1038_v33, %s3500_s12  ;;  %v1871_v8 = vor.u32 %v1869_v3, %v4318_v5  ;;  %v909_v37 = vshll.u32 %v4468_v42, 16  ;;  %v4507_v33 = vrot.slane %v1873_v46, 1 }
 0x11f   : > { %v1508_v25 = vsel %vm1077_vm2, %v1498_v61, %v4339_v4  ;;  %v800_v16 = vsel %vm772_vm11, %v795_v26, %v4464_v51  ;;  %v2254_v46 = vsel %vm5467_vm14, %v3400_v52, 0 }
 0x120   : > { %v1261_v28 = vpop.permute.xlu1 %1260  ;;  %v1368_v63 = vpop.permute.xlu0 %1367 }
 0x121   : > { %v1494_v50 = vsel %vm1055_vm0, %v3822_v58, %v1261_v28  ;;  %v1518_v4 = vsel %vm1088_vm3, %v1508_v25, %v1368_v63  ;;  %v834_v25 = vsel %vm827_vm8, %v831_v10, %v833_v40  ;;  %v908_v28 = vrot.slane %v906_v54, 1  ;;  %v3396_v54 = vld [vmem:[%s5453_s4 + $0x20] ss:$0 sps:$4 sm:$0xff]  }
 0x122   : > { %v1504_v26 = vsel %vm1066_vm1, %v1494_v50, %v4361_v60  ;;  %v1528_v58 = vsel %vm1099_vm4, %v1518_v4, %v4363_v36  ;;  %2097 = vrot.lane.b32.xlu1 %v2072_v27, %s3503_s29  ;;  %821 = vrot.lane.b32.xlu0 %v800_v16, %s3501_s27  ;;  %v4511_v60 = vcombine.low %v4366_v2, %v4479_v22  ;;  %v911_v63 = vrot.slane %v909_v37, 2 }
 0x123   : > { %v1514_v3 = vsel %vm1077_vm2, %v1504_v26, %v4386_v29  ;;  %v1538_v5 = vsel %vm1110_vm5, %v1528_v58, %v4388_v57  ;;  %v862_v57 = vrot.slane %v4468_v42, 1  ;;  %v1876_v16 = vsel %vm772_vm11, %v1871_v8, %v4507_v33  ;;  %v4542_v8 = vld [vmem:[%s3940_s26 + $0x24] sm:$0xf] }
 0x124   : > { %v1374_v36 = vpop.permute.xlu1 %1373  ;;  %v1457_v61 = vpop.permute.xlu0 %1456  ;;  %v1908_v50 = vrot.slane %v4376_v53, 1  ;;  %v1980_v4 = vshrl.u32 %v4511_v60, 16 }
 0x125   : > { %v1524_v29 = vsel %vm1088_vm3, %v1514_v3, %v1374_v36  ;;  %v1548_v27 = vsel %vm1121_vm6, %v1538_v5, %v1457_v61  ;;  %v863_v58 = vsel %vm827_vm8, %v860_v17, %v862_v57  ;;  %v1937_v3 = vrot.slane %v4511_v60, 1 }
 0x126   : > { %v1534_v2 = vsel %vm1099_vm4, %v1524_v29, %v4406_v38  ;;  %2118 = vrot.lane.b32.xlu1 %v2109_v23, %s3500_s12  ;;  %843 = vrot.lane.b32.xlu0 %v834_v25, %s3497_s22  ;;  %v1558_v10 = vsel %vm1132_vm7, %v1548_v27, %v4408_v39  ;;  %v1983_v38 = vshll.u32 %v4511_v60, 16  ;;  %v3404_v39 = vld [vmem:[%s5453_s4 + $0x60] sm:$0xff]   ;;  %v1909_v17 = vsel %vm827_vm8, %v1906_v44, %v1908_v50 }
 0x127   : > { %3161 = vmatmul.mubr.msk.bf16.vlgmr.msra.gmra.mxu0 %vm1604_vm10, %v1558_v10  ;;  %v1544_v26 = vsel %vm1110_vm5, %v1534_v2, %v4429_v56  ;;  %v4557_v56 = vor.u32 %v911_v63, %v908_v28  ;;  %v1982_v5 = vrot.slane %v1980_v4, 1  ;;  %v4571_v27 = vld [vmem:[%s3797_s19 + $0x24] sm:$0xf]  ;;  %v1730_v10 = vsel %vm5467_vm14, %v3396_v54, 0 }
 0x128   : > { %v1257_v23 = vpop.permute.xlu1 %1256  ;;  %v1463_v52 = vpop.permute.xlu0 %1462  ;;  %3164 = vmatprep.mubr.msk.bf16.mxu0 %vm3505_vm15, %v3504_v18  ;;  %3211 = vmatpush3.bf16.msra.mxu0 %v2254_v46  ;;  %v1985_v36 = vrot.slane %v1983_v38, 2  ;;  %v3406_v46 = vld [vmem:[%s5453_s4 + $0x58] sm:$0xff]   ;;  %v948_v28 = vrot.slane %v4468_v42, 2  ;;  %vm5481_vm14 = vcmask 1044480  }
 0x129   : > { %3212 = vmatprep.subr.bf16.mxu0 %v3504_v18  ;;  %v1490_v37 = vsel %vm1055_vm0, %v3807_v47, %v1257_v23  ;;  %v1554_v61 = vsel %vm1121_vm6, %v1544_v26, %v1463_v52  ;;  %v4568_v47 = vcombine.low %v4458_v0, %v4542_v8  ;;  %v913_v0 = vsel %vm878_vm12, %v4348_v11, %v4557_v56 }
 0x12a   : > { %1897 = vrot.lane.b32.xlu1 %v1876_v16, %s3501_s27  ;;  %872 = vrot.lane.b32.xlu0 %v863_v58, %s3496_s25  ;;  %v1500_v44 = vsel %vm1066_vm1, %v1490_v37, %v4427_v49  ;;  %v4591_v49 = vcombine.low %v4479_v22, %v4571_v27  ;;  %v1938_v16 = vsel %vm827_vm8, %v1935_v7, %v1937_v3  ;;  %v3398_v22 = vld [vmem:[%s5453_s4 + $0x18] sm:$0xff]   ;;  %v3408_v7 = vld [vmem:[%s5453_s4 + $0x50] sm:$0xff]   ;;  %v2021_v26 = vrot.slane %v4511_v60, 2 }
 0x12b   : > { %v809_v63 = vshrl.u32 %v4568_v47, 16  ;;  %v4598_v4 = vor.u32 %v1985_v36, %v1982_v5  ;;  %v1510_v11 = vsel %vm1077_vm2, %v1500_v44, %v4444_v55  ;;  %v805_v52 = vshll.u32 %v4568_v47, 16 }
 0x12c   : > { %v1370_v25 = vpop.permute.xlu1 %1369  ;;  %v1484_v29 = vpop.permute.xlu0 %1483  ;;  %3213 = vmatpush3.bf16.msra.mxu0 %v3404_v39  ;;  %v973_v39 = vrot.slane %v4568_v47, 2  ;;  %v949_v55 = vsel %vm942_vm9, %v946_v45, %v948_v28  ;;  %v1881_v14 = vshll.u32 %v4591_v49, 16  ;;  %v1885_v45 = vshrl.u32 %v4591_v49, 16 }
 0x12d   : > { %v1564_v2 = vsel %vm1132_vm7, %v1554_v61, %v1484_v29  ;;  %3214 = vmatprep.subr.bf16.mxu0 %v3504_v18  ;;  %v1001_v58 = vrot.slane %v809_v63, 2  ;;  %v1002_v54 = vrot.slane %v805_v52, 3  ;;  %v1520_v37 = vsel %vm1088_vm3, %v1510_v11, %v1370_v25  ;;  %v3399_v25 = vld [vmem:[%s5453_s4 + $0x10] sm:$0xff]   ;;  %v3410_v29 = vld [vmem:[%s5453_s4 + $0x48] sm:$0xff]  }
 0x12e   : > { %1918 = vrot.lane.b32.xlu1 %v1909_v17, %s3497_s22  ;;  %3173 = vmatmul.mubr.msk.bf16.vlgmr.msra.gmra.mxu1 %vm1604_vm10, %v1564_v2  ;;  %v1987_v17 = vsel %vm878_vm12, %v4383_v48, %v4598_v4  ;;  %v974_v48 = vsel %vm942_vm9, %v971_v30, %v973_v39  ;;  %v2074_v30 = vrot.slane %v1881_v14, 3 }
 0x12f   : > { %936 = vrot.lane.b32.xlu0 %v913_v0, %s3502_s28  ;;  %3176 = vmatprep.mubr.msk.bf16.mxu1 %vm3505_vm15, %v3504_v18  ;;  %v4654_v44 = vor.u32 %v1002_v54, %v1001_v58  ;;  %v2073_v0 = vrot.slane %v1885_v45, 2  ;;  %v4687_v58 = vld [vmem:[%s3940_s26 + $0x28] sm:$0xf] }
 0x130   : > { %v1416_v38 = vpop.permute.xlu1 %1415  ;;  %v1391_v23 = vpop.permute.xlu0 %1390  ;;  %3181 = vmatpush3.bf16.msra.mxu1 %v1730_v10  ;;  %3215 = vmatpush3.bf16.msra.mxu0 %v3406_v46  ;;  %v2022_v46 = vsel %vm942_vm9, %v2019_v19, %v2021_v26  ;;  %v2046_v10 = vrot.slane %v4591_v49, 2  ;;  %v3403_v19 = vld [vmem:[%s5453_s4 + $0x8] sm:$0xff]  }
 0x131   : > { %3182 = vmatprep.subr.bf16.mxu1 %v3504_v18  ;;  %3216 = vmatprep.subr.bf16.mxu0 %v3504_v18  ;;  %v1530_v5 = vsel %vm1099_vm4, %v1520_v37, %v1391_v23  ;;  %v1004_v23 = vsel %vm989_vm13, %v4415_v6, %v4654_v44  ;;  %v3405_v6 = vld [vmem:[%s5453_s4] sm:$0xff]  }
 0x132   : > { %1947 = vrot.lane.b32.xlu1 %v1938_v16, %s3496_s25  ;;  %v1540_v2 = vsel %vm1110_vm5, %v1530_v5, %v1416_v38  ;;  %v4708_v5 = vcombine.low %v4542_v8, %v4687_v58  ;;  %v835_v8 = vrot.slane %v4568_v47, 1 }
 0x133   : > { %958 = vrot.lane.b32.xlu0 %v949_v55, %s3498_s9  ;;  %v4684_v55 = vor.u32 %v2074_v30, %v2073_v0  ;;  %v1879_v0 = vor.u32 %v1877_v21, %v4507_v33  ;;  %v4742_v30 = vrot.slane %v1881_v14, 1 }
 0x134   : > { %v1459_v36 = vpop.permute.xlu1 %1458  ;;  %v4633_v61 = vpop.permute.xlu0 %1262  ;;  %3183 = vmatpush3.bf16.msra.mxu1 %v3398_v22  ;;  %3217 = vmatpush3.bf16.msra.mxu0 %v3408_v7  ;;  %v1039_v22 = vrot.slane %v4568_v47, 3  ;;  %v2047_v7 = vsel %vm942_vm9, %v2044_v31, %v2046_v10  ;;  %v836_v21 = vsel %vm827_vm8, %v833_v40, %v835_v8 }
 0x135   : > { %3184 = vmatprep.subr.bf16.mxu1 %v3504_v18  ;;  %3218 = vmatprep.subr.bf16.mxu0 %v3504_v18  ;;  %v1550_v16 = vsel %vm1121_vm6, %v1540_v2, %v1459_v36  ;;  %v2076_v36 = vsel %vm989_vm13, %v4442_v9, %v4684_v55  ;;  %v918_v2 = vshll.u32 %v4708_v5, 16 }
 0x136   : > { %2010 = vrot.lane.b32.xlu1 %v1987_v17, %s3502_s28  ;;  %v1040_v31 = vsel %vm5481_vm14, %v1037_v20, %v1039_v22  ;;  %v803_v17 = vor.u32 %v801_v1, %v4464_v51  ;;  %v4719_v1 = vrot.slane %v805_v52, 1  ;;  %v4722_v51 = vld [vmem:[%s3797_s19 + $0x28] sm:$0xf] }
 0x137   : > { %983 = vrot.lane.b32.xlu0 %v974_v48, %s3499_s10  ;;  %v920_v14 = vrot.slane %v918_v2, 2 }
 0x138   : > { %v1480_v12 = vpop.permute.xlu1 %1479  ;;  %v4664_v11 = vpop.permute.xlu0 %1283  ;;  %3185 = vmatpush3.bf16.msra.mxu1 %v3399_v25  ;;  %3219 = vmatpush3.bf16.msra.mxu0 %v3410_v29  ;;  %v2110_v25 = vrot.slane %v4591_v49, 3  ;;  %v3506_v29 = vmov 0   ;;  %v808_v9 = vsel %vm772_vm11, %v803_v17, %v4719_v1 }
 0x139   : > { %v1560_v38 = vsel %vm1132_vm7, %v1550_v16, %v1480_v12  ;;  %3186 = vmatprep.subr.bf16.mxu1 %v3504_v18  ;;  %3262 = vmatprep.subr.bf16.mxu0 %v3504_v18  ;;  %v4746_v16 = vcombine.low %v4571_v27, %v4722_v51  ;;  %v1884_v27 = vsel %vm772_vm11, %v1879_v0, %v4742_v30 }
 0x13a   : > { %2031 = vrot.lane.b32.xlu1 %v2022_v46, %s3498_s9  ;;  %3165 = vmatmul.mubr.msk.bf16.gmra.mxu0 %vm1604_vm10, %v1560_v38  ;;  %v915_v46 = vshrl.u32 %v4708_v5, 16  ;;  %v2111_v52 = vsel %vm5481_vm14, %v2108_v43, %v2110_v25  ;;  %v1910_v38 = vrot.slane %v4591_v49, 1  ;;  %v5468_v43 = vrot.slane %v4708_v5, 1 }
 0x13b   : > { %1027 = vrot.lane.b32.xlu0 %v1004_v23, %s3503_s29  ;;  %3168 = vmatprep.mubr.msk.bf16.mxu0 %vm3505_vm15, %v3504_v18  ;;  %v4757_v23 = vld [vmem:[%s3940_s26 + $0x2c] sm:$0xf] }
 0x13c   : > { %v1313_v54 = vpop.permute.xlu1 %1312  ;;  %v4691_v37 = vpop.permute.xlu0 %1258  ;;  %3187 = vmatpush3.bf16.msra.mxu1 %v3403_v19  ;;  %3354 = vset.pattern.permute.xlu1 %v3506_v29  ;;  %v917_v33 = vrot.slane %v915_v46, 1  ;;  %v4766_v40 = vcombine.low %v4687_v58, %v4757_v23 }
 0x13d   : > { %3188 = vmatprep.subr.bf16.mxu1 %v3504_v18  ;;  %3353 = vset.pattern.permute.xlu0 %v3506_v29  ;;  %v865_v29 = vsel %vm827_vm8, %v862_v57, %v5468_v43 }
 0x13e   : > { %2056 = vrot.lane.b32.xlu1 %v2047_v7, %s3499_s10  ;;  %v1989_v7 = vshrl.u32 %v4746_v16, 16  ;;  %v4782_v46 = vor.u32 %v920_v14, %v917_v33  ;;  %v1006_v14 = vshrl.u32 %v4766_v40, 16 }
 0x13f   : > { %1049 = vrot.lane.b32.xlu0 %v1040_v31, %s3500_s12 }
 0x140   : > { %v1376_v48 = vpop.permute.xlu1 %1375  ;;  %v4715_v20 = vpop.permute.xlu0 %1279  ;;  %3189 = vmatpush3.bf16.msra.mxu1 %v3405_v6  ;;  %v1992_v6 = vshll.u32 %v4746_v16, 16 }
 0x141   : > { %3240 = vmatprep.subr.bf16.mxu1 %v3504_v18 }
 0x142   : > { %2099 = vrot.lane.b32.xlu1 %v2076_v36, %s3503_s29  ;;  %v1496_v36 = vsel %vm1055_vm0, %v3828_v62, %v4633_v61  ;;  %v1939_v62 = vrot.slane %v4746_v16, 1  ;;  %v1991_v61 = vrot.slane %v1989_v7, 1 }
 0x143   : > { %823 = vrot.lane.b32.xlu0 %v808_v9, %s3501_s27  ;;  %v1911_v9 = vsel %vm827_vm8, %v1908_v50, %v1910_v38  ;;  %v1506_v2 = vsel %vm1066_vm1, %v1496_v36, %v4664_v11  ;;  %v950_v50 = vrot.slane %v4708_v5, 2  ;;  %v922_v11 = vsel %vm878_vm12, %v4557_v56, %v4782_v46 }
 0x144   : > { %v1397_v12 = vpop.permute.xlu1 %1396  ;;  %v1309_v19 = vpop.permute.xlu0 %1308  ;;  %v1516_v0 = vsel %vm1077_vm2, %v1506_v2, %v1313_v54  ;;  %v1009_v54 = vshll.u32 %v4766_v40, 16  ;;  %v2023_v2 = vrot.slane %v4746_v16, 2 }
 0x145   : > { %v1526_v43 = vsel %vm1088_vm3, %v1516_v0, %v1376_v48  ;;  %v1940_v48 = vsel %vm827_vm8, %v1937_v3, %v1939_v62  ;;  %v975_v3 = vrot.slane %v4766_v40, 2 }
 0x146   : > { %2120 = vrot.lane.b32.xlu1 %v2111_v52, %s3500_s12  ;;  %v1994_v52 = vrot.slane %v1992_v6, 2  ;;  %v1536_v33 = vsel %vm1099_vm4, %v1526_v43, %v1397_v12 }
 0x147   : > { %845 = vrot.lane.b32.xlu0 %v836_v21, %s3497_s22 }
 0x148   : > { %v1422_v31 = vpop.permute.xlu1 %1421  ;;  %v1372_v17 = vpop.permute.xlu0 %1371  ;;  %v4808_v12 = vor.u32 %v1994_v52, %v1991_v61  ;;  %v1008_v61 = vrot.slane %v1006_v14, 2  ;;  %v1011_v52 = vrot.slane %v1009_v54, 3 }
 0x149   : > { %v1546_v7 = vsel %vm1110_vm5, %v1536_v33, %v1422_v31 }
 0x14a   : > { %1899 = vrot.lane.b32.xlu1 %v1884_v27, %s3501_s27  ;;  %v4790_v27 = vld [vmem:[%s3797_s19 + $0x2c] sm:$0xf]  ;;  %v1996_v42 = vsel %vm878_vm12, %v4598_v4, %v4808_v12  ;;  %v976_v4 = vsel %vm942_vm9, %v973_v39, %v975_v3  ;;  %v4854_v14 = vor.u32 %v1011_v52, %v1008_v61 }
 0x14b   : > { %874 = vrot.lane.b32.xlu0 %v865_v29, %s3496_s25  ;;  %v4812_v43 = vcombine.low %v4722_v51, %v4790_v27  ;;  %v951_v29 = vsel %vm942_vm9, %v948_v28, %v950_v50 }
 0x14c   : > { %v1465_v57 = vpop.permute.xlu1 %1464  ;;  %v1393_v21 = vpop.permute.xlu0 %1392 }
 0x14d   : > { %v1556_v56 = vsel %vm1121_vm6, %v1546_v7, %v1465_v57  ;;  %v2078_v28 = vshrl.u32 %v4812_v43, 16  ;;  %v2048_v39 = vrot.slane %v4812_v43, 2 }
 0x14e   : > { %1920 = vrot.lane.b32.xlu1 %v1911_v9, %s3497_s22  ;;  %v1492_v9 = vsel %vm1055_vm0, %v3824_v59, %v4691_v37  ;;  %v2081_v59 = vshll.u32 %v4812_v43, 16 }
 0x14f   : > { %938 = vrot.lane.b32.xlu0 %v922_v11, %s3502_s28  ;;  %v1502_v0 = vsel %vm1066_vm1, %v1492_v9, %v4715_v20  ;;  %v3049_v9 = vcombine.low %v4722_v51, %v4722_v51  ;;  %v4894_v51 = vcombine.low %v4757_v23, %v4757_v23 }
 0x150   : > { %v1486_v6 = vpop.permute.xlu1 %1485  ;;  %v1418_v36 = vpop.permute.xlu0 %1417  ;;  %v1512_v37 = vsel %vm1077_vm2, %v1502_v0, %v1309_v19  ;;  %v2024_v19 = vsel %vm942_vm9, %v2021_v26, %v2023_v2  ;;  %v2083_v7 = vrot.slane %v2081_v59, 3  ;;  %v1013_v26 = vsel %vm989_vm13, %v4654_v44, %v4854_v14 }
 0x151   : > { %v1566_v31 = vsel %vm1132_vm7, %v1556_v56, %v1486_v6  ;;  %v1522_v20 = vsel %vm1088_vm3, %v1512_v37, %v1372_v17  ;;  %v2987_v17 = vcombine.low %v4687_v58, %v4687_v58  ;;  %v1041_v58 = vrot.slane %v4766_v40, 3  ;;  %v2357_v40 = vld [vmem:[%s3634_s5 + $0x8] sm:$0xff] }
 0x152   : > { %1949 = vrot.lane.b32.xlu1 %v1940_v48, %s3496_s25  ;;  %3177 = vmatmul.mubr.msk.bf16.gmra.mxu1 %vm1604_vm10, %v1566_v31  ;;  %v1532_v11 = vsel %vm1099_vm4, %v1522_v20, %v1393_v21  ;;  %v2080_v21 = vrot.slane %v2078_v28, 2  ;;  %v2049_v31 = vsel %vm942_vm9, %v2046_v10, %v2048_v39  ;;  %v811_v10 = vor.u32 %v809_v63, %v4719_v1 }
 0x153   : > { %960 = vrot.lane.b32.xlu0 %v951_v29, %s3498_s9  ;;  %3190 = vmatprep.mubr.msk.bf16.mxu1 %vm3505_vm15, %v3504_v18  ;;  %v1542_v54 = vsel %vm1110_vm5, %v1532_v11, %v1418_v36  ;;  %v813_v36 = vshll.u32 %v2987_v17, 16  ;;  %v1042_v52 = vsel %vm5481_vm14, %v1039_v22, %v1041_v58  ;;  %v2112_v28 = vrot.slane %v4812_v43, 3  ;;  %v2358_v43 = vld [vmem:[%s3634_s5 + $0x10] sm:$0xff] }
 0x154   : > { %v1461_v57 = vpop.permute.xlu1 %1460  ;;  %v4839_v33 = vpop.permute.xlu0 %817  ;;  %v4875_v29 = vor.u32 %v2083_v7, %v2080_v21  ;;  %v1889_v59 = vshll.u32 %v3049_v9, 16  ;;  %v837_v1 = vrot.slane %v2987_v17, 1  ;;  %v924_v23 = vshrl.u32 %v4894_v51, 16 }
 0x155   : > { %v1552_v48 = vsel %vm1121_vm6, %v1542_v54, %v1461_v57  ;;  %v815_v0 = vrot.slane %v813_v36, 1  ;;  %v927_v57 = vshll.u32 %v4894_v51, 16  ;;  %v1887_v20 = vor.u32 %v1885_v45, %v4742_v30 }
 0x156   : > { %2012 = vrot.lane.b32.xlu1 %v1996_v42, %s3502_s28  ;;  %v2085_v42 = vsel %vm989_vm13, %v4684_v55, %v4875_v29  ;;  %v2113_v55 = vsel %vm5481_vm14, %v2110_v25, %v2112_v28  ;;  %v4918_v11 = vcombine.low %v4790_v27, %v4790_v27  ;;  %v838_v54 = vsel %vm827_vm8, %v835_v8, %v837_v1 }
 0x157   : > { %985 = vrot.lane.b32.xlu0 %v976_v4, %s3499_s10  ;;  %v816_v63 = vsel %vm772_vm11, %v811_v10, %v815_v0  ;;  %v1891_v4 = vrot.slane %v1889_v59, 1  ;;  %v866_v25 = vrot.slane %v4894_v51, 1  ;;  %v926_v21 = vrot.slane %v924_v23, 1 }
 0x158   : > { %v1482_v56 = vpop.permute.xlu1 %1481  ;;  %v840_v6 = vpop.permute.xlu0 %839  ;;  %v929_v7 = vrot.slane %v927_v57, 2  ;;  %v1912_v30 = vrot.slane %v3049_v9, 1  ;;  %v1998_v27 = vshrl.u32 %v4918_v11, 16  ;;  %v1057_v8 = vsel %vm1055_vm0, %v4090_v32, %v4839_v33  ;;  %v4938_v9 = vld [vmem:[%s3940_s26 + $0x30] ss:$0 sps:$4 sm:$0xff]  }
 0x159   : > { %v1562_v60 = vsel %vm1132_vm7, %v1552_v48, %v1482_v56  ;;  %v1892_v45 = vsel %vm772_vm11, %v1887_v20, %v1891_v4  ;;  %v2001_v48 = vshll.u32 %v4918_v11, 16  ;;  %v1068_v10 = vsel %vm1066_vm1, %v1057_v8, %v840_v6 }
 0x15a   : > { %2033 = vrot.lane.b32.xlu1 %v2024_v19, %s3498_s9  ;;  %3169 = vmatmul.mubr.msk.bf16.gmra.mxu0 %vm1604_vm10, %v1562_v60  ;;  %v1913_v0 = vsel %vm827_vm8, %v1910_v38, %v1912_v30  ;;  %v2000_v32 = vrot.slane %v1998_v27, 1  ;;  %v952_v23 = vrot.slane %v4894_v51, 2  ;;  %v1015_v38 = vshrl.u32 %v4938_v9, 16 }
 0x15b   : > { %1029 = vrot.lane.b32.xlu0 %v1013_v26, %s3503_s29  ;;  %3220 = vmatprep.mubr.msk.bf16.mxu0 %vm3505_vm15, %v3504_v18  ;;  %v5482_v26 = vrot.slane %v4708_v5, 1  ;;  %v2003_v33 = vrot.slane %v2001_v48, 2  ;;  %v1043_v16 = vrot.slane %v4938_v9, 3  ;;  %vm5485_vm11 = vcmask 1043456  }
 0x15c   : > { %v4881_v44 = vpop.permute.xlu1 %1893  ;;  %v869_v61 = vpop.permute.xlu0 %868 }
 0x15d   : > { %v867_v36 = vsel %vm827_vm8, %v5482_v26, %v866_v25  ;;  %v2004_v51 = vor.u32 %v2003_v33, %v2000_v32  ;;  %v977_v25 = vrot.slane %v4938_v9, 2 }
 0x15e   : > { %2058 = vrot.lane.b32.xlu1 %v2049_v31, %s3499_s10  ;;  %v930_v31 = vor.u32 %v929_v7, %v926_v21  ;;  %v2127_v21 = vsel %vm1055_vm0, %v4118_v41, %v4881_v44  ;;  %v1017_v7 = vrot.slane %v1015_v38, 2  ;;  %v2025_v41 = vrot.slane %v4918_v11, 2 }
 0x15f   : > { %1051 = vrot.lane.b32.xlu0 %v1042_v52, %s3500_s12  ;;  %v1941_v52 = vrot.slane %v4918_v11, 1  ;;  %v2005_v27 = vsel %vm878_vm12, %v4808_v12, %v2004_v51  ;;  %v978_v12 = vsel %vm942_vm9, %v975_v3, %v977_v25 }
 0x160   : > { %v4901_v37 = vpop.permute.xlu1 %1914  ;;  %v933_v22 = vpop.permute.xlu0 %932  ;;  %v931_v6 = vsel %vm878_vm12, %v4782_v46, %v930_v31 }
 0x161   : > { %v2137_v30 = vsel %vm1066_vm1, %v2127_v21, %v4901_v37 }
 0x162   : > { %2101 = vrot.lane.b32.xlu1 %v2085_v42, %s3503_s29  ;;  %v1079_v42 = vsel %vm1077_vm2, %v1068_v10, %v869_v61 }
 0x163   : > { %825 = vrot.lane.b32.xlu0 %v816_v63, %s3501_s27  ;;  %v1090_v1 = vsel %vm1088_vm3, %v1079_v42, %v933_v22  ;;  %v1942_v22 = vsel %vm827_vm8, %v1939_v62, %v1941_v52  ;;  %v953_v62 = vsel %vm942_vm9, %v950_v50, %v952_v23  ;;  %vm5483_vm8 = vmmov %vm5481_vm14 }
 0x164   : > { %v1944_v19 = vpop.permute.xlu1 %1943  ;;  %v955_v17 = vpop.permute.xlu0 %954 }
 0x165   : > { %v1101_v57 = vsel %vm1099_vm4, %v1090_v1, %v955_v17  ;;  %v2147_v5 = vsel %vm1077_vm2, %v2137_v30, %v1944_v19  ;;  %v2026_v19 = vsel %vm942_vm9, %v2023_v2, %v2025_v41 }
 0x166   : > { %2122 = vrot.lane.b32.xlu1 %v2113_v55, %s3500_s12  ;;  %v1018_v55 = vshll.u32 %v4938_v9, 16 }
 0x167   : > { %847 = vrot.lane.b32.xlu0 %v838_v54, %s3497_s22  ;;  %v3411_v54 = vld [vmem:[%s3797_s19 + $0x30] ss:$0 sps:$4 sm:$0xff]  }
 0x168   : > { %v2007_v56 = vpop.permute.xlu1 %2006  ;;  %v980_v60 = vpop.permute.xlu0 %979  ;;  %v2087_v48 = vshrl.u32 %v3411_v54, 16  ;;  %v2114_v33 = vrot.slane %v3411_v54, 3 }
 0x169   : > { %v1112_v61 = vsel %vm1110_vm5, %v1101_v57, %v980_v60  ;;  %v2090_v60 = vshll.u32 %v3411_v54, 16  ;;  %v2157_v8 = vsel %vm1088_vm3, %v2147_v5, %v2007_v56 }
 0x16a   : > { %1901 = vrot.lane.b32.xlu1 %v1892_v45, %s3501_s27  ;;  %v1020_v45 = vrot.slane %v1018_v55, 3  ;;  %v2089_v10 = vrot.slane %v2087_v48, 2  ;;  %v2359_v55 = vld [vmem:[%s3634_s5 + $0x18] sm:$0xff]  ;;  %s5486_s27 = sld [smem:[#allocation9_spill]] }
 0x16b   : > { %876 = vrot.lane.b32.xlu0 %v867_v36, %s3496_s25  ;;  %v2050_v36 = vrot.slane %v3411_v54, 2 }
 0x16c   : > { %v2028_v59 = vpop.permute.xlu1 %2027  ;;  %v1024_v63 = vpop.permute.xlu0 %1023  ;;  %v1021_v11 = vor.u32 %v1020_v45, %v1017_v7 }
 0x16d   : > { %v1123_v20 = vsel %vm1121_vm6, %v1112_v61, %v1024_v63  ;;  %v2167_v37 = vsel %vm1099_vm4, %v2157_v8, %v2028_v59  ;;  %v2051_v2 = vsel %vm942_vm9, %v2048_v39, %v2050_v36  ;;  %vm5484_vm9 = vmmov %vm5483_vm8  ;;  %v2363_v36 = vld [vmem:[%s3634_s5 + $0x38] sm:$0xff] }
 0x16e   : > { %1922 = vrot.lane.b32.xlu1 %v1913_v0, %s3497_s22  ;;  %v2092_v0 = vrot.slane %v2090_v60, 3  ;;  %v1022_v3 = vsel %vm989_vm13, %v4854_v14, %v1021_v11  ;;  %v1044_v14 = vsel %vm5483_vm8, %v1041_v58, %v1043_v16  ;;  %v2115_v39 = vsel %vm5484_vm9, %v2112_v28, %v2114_v33 }
 0x16f   : > { %940 = vrot.lane.b32.xlu0 %v931_v6, %s3502_s28  ;;  %v2356_v6 = vld [vmem:[%s3634_s5] sm:$0xff] }
 0x170   : > { %v2053_v4 = vpop.permute.xlu1 %2052  ;;  %v1046_v17 = vpop.permute.xlu0 %1045  ;;  %v2093_v63 = vor.u32 %v2092_v0, %v2089_v10 }
 0x171   : > { %v1134_v46 = vsel %vm1132_vm7, %v1123_v20, %v1046_v17  ;;  %v2177_v26 = vsel %vm1110_vm5, %v2167_v37, %v2053_v4  ;;  %v2361_v17 = vld [vmem:[%s3634_s5 + $0x28] sm:$0xff] }
 0x172   : > { %1951 = vrot.lane.b32.xlu1 %v1942_v22, %s3496_s25  ;;  %3191 = vmatmul.mubr.msk.bf16.vlgmr.msra.gmra.mxu1 %vm1604_vm10, %v1134_v46  ;;  %v2094_v23 = vsel %vm989_vm13, %v4875_v29, %v2093_v63  ;;  %v2360_v22 = vld [vmem:[%s3634_s5 + $0x20] sm:$0xff] }
 0x173   : > { %962 = vrot.lane.b32.xlu0 %v953_v62, %s3498_s9  ;;  %3194 = vmatprep.mubr.msk.bf16.mxu1 %vm3505_vm15, %v3504_v18 }
 0x174   : > { %v2096_v50 = vpop.permute.xlu1 %2095  ;;  %v820_v44 = vpop.permute.xlu0 %819 }
 0x175   : > { %v2187_v56 = vsel %vm1121_vm6, %v2177_v26, %v2096_v50  ;;  %v1059_v61 = vsel %vm1055_vm0, %v4116_v34, %v820_v44  ;;  %v2362_v26 = vld [vmem:[%s3634_s5 + $0x30] sm:$0xff] }
 0x176   : > { %2014 = vrot.lane.b32.xlu1 %v2005_v27, %s3502_s28 }
 0x177   : > { %987 = vrot.lane.b32.xlu0 %v978_v12, %s3499_s10 }
 0x178   : > { %v2117_v31 = vpop.permute.xlu1 %2116  ;;  %v842_v52 = vpop.permute.xlu0 %841 }
 0x179   : > { %v2197_v32 = vsel %vm1132_vm7, %v2187_v56, %v2117_v31  ;;  %v1070_v29 = vsel %vm1066_vm1, %v1059_v61, %v842_v52 }
 0x17a   : > { %2035 = vrot.lane.b32.xlu1 %v2026_v19, %s3498_s9  ;;  %3221 = vmatmul.mubr.msk.bf16.vlgmr.msra.gmra.mxu0 %vm1604_vm10, %v2197_v32 }
 0x17b   : > { %1031 = vrot.lane.b32.xlu0 %v1022_v3, %s3503_s29  ;;  %3224 = vmatprep.mubr.msk.bf16.mxu0 %vm3505_vm15, %v3504_v18 }
 0x17c   : > { %v1896_v42 = vpop.permute.xlu1 %1895  ;;  %v871_v59 = vpop.permute.xlu0 %870 }
 0x17d   : > { %v1081_v51 = vsel %vm1077_vm2, %v1070_v29, %v871_v59  ;;  %v2129_v45 = vsel %vm1055_vm0, %v4139_v15, %v1896_v42 }
 0x17e   : > { %2060 = vrot.lane.b32.xlu1 %v2051_v2, %s3499_s10 }
 0x17f   : > { %1053 = vrot.lane.b32.xlu0 %v1044_v14, %s3500_s12 }
 0x180   : > { %v1917_v9 = vpop.permute.xlu1 %1916  ;;  %v935_v1 = vpop.permute.xlu0 %934 }
 0x181   : > { %v1092_v54 = vsel %vm1088_vm3, %v1081_v51, %v935_v1  ;;  %v2139_v30 = vsel %vm1066_vm1, %v2129_v45, %v1917_v9  ;;  %v2364_v51 = vld [vmem:[%s3634_s5 + $0x40] sm:$0xff] }
 0x182   : > { %2124 = vrot.lane.b32.xlu1 %v2115_v39, %s3500_s12 }
 0x183   : > { %2103 = vrot.lane.b32.xlu0 %v2094_v23, %s3503_s29 }
 0x184   : > { %v1946_v57 = vpop.permute.xlu1 %1945  ;;  %v957_v58 = vpop.permute.xlu0 %956 }
 0x185   : > { %v1103_v46 = vsel %vm1099_vm4, %v1092_v54, %v957_v58  ;;  %v2149_v27 = vsel %vm1077_vm2, %v2139_v30, %v1946_v57  ;;  %v2455_v54 = vld [vmem:[%s5457_s8] sm:$0xf] }
 0x186   : > { %2374 = vperm.xlu1 %3354, %v2357_v40  }
 0x187   : > { %2369 = vperm.xlu0 %3353, %v2356_v6  }
 0x188   : > { %v2009_v38 = vpop.permute.xlu1 %2008  ;;  %v982_v28 = vpop.permute.xlu0 %981 }
 0x189   : > { %v1114_v25 = vsel %vm1110_vm5, %v1103_v46, %v982_v28  ;;  %v2159_v50 = vsel %vm1088_vm3, %v2149_v27, %v2009_v38 }
 0x18a   : > { %2379 = vperm.xlu1 %3354, %v2358_v43  }
 0x18b   : > { %2384 = vperm.xlu0 %3353, %v2359_v55  }
 0x18c   : > { %v2030_v20 = vpop.permute.xlu1 %2029  ;;  %v1026_v4 = vpop.permute.xlu0 %1025 }
 0x18d   : > { %v1125_v34 = vsel %vm1121_vm6, %v1114_v25, %v1026_v4  ;;  %v2169_v44 = vsel %vm1099_vm4, %v2159_v50, %v2030_v20  ;;  %v2489_v25 = vsel %vm5485_vm11, %v2455_v54, 0 }
 0x18e   : > { %2389 = vperm.xlu1 %3354, %v2360_v22   ;;  %3241 = vmatpush3.bf16.msra.mxu1 %v2489_v25 }
 0x18f   : > { %2394 = vperm.xlu0 %3353, %v2361_v17   ;;  %v2365_v17 = vld [vmem:[%s3634_s5 + $0x48] sm:$0xff] }
 0x190   : > { %v2055_v21 = vpop.permute.xlu1 %2054  ;;  %v1048_v62 = vpop.permute.xlu0 %1047 }
 0x191   : > { %v1136_v7 = vsel %vm1132_vm7, %v1125_v34, %v1048_v62  ;;  %v2179_v48 = vsel %vm1110_vm5, %v2169_v44, %v2055_v21 }
 0x192   : > { %3195 = vmatmul.mubr.msk.bf16.gmra.mxu1 %vm1604_vm10, %v1136_v7  ;;  %2399 = vperm.xlu1 %3354, %v2362_v26  }
 0x193   : > { %3198 = vmatprep.mubr.msk.bf16.mxu1 %vm3505_vm15, %v3504_v18  ;;  %2404 = vperm.xlu0 %3353, %v2363_v36  }
 0x194   : > { %v2098_v41 = vpop.permute.xlu1 %2097  ;;  %v822_v5 = vpop.permute.xlu0 %821 }
 0x195   : > { %v2189_v15 = vsel %vm1121_vm6, %v2179_v48, %v2098_v41  ;;  %v1061_v32 = vsel %vm1055_vm0, %v4223_v13, %v822_v5 }
 0x196   : > { %2409 = vperm.xlu1 %3354, %v2364_v51  }
 0x197   : > { %2414 = vperm.xlu0 %3353, %v2365_v17  }
 0x198   : > { %v2119_v60 = vpop.permute.xlu1 %2118  ;;  %v844_v8 = vpop.permute.xlu0 %843 }
 0x199   : > { %v2199_v37 = vsel %vm1132_vm7, %v2189_v15, %v2119_v60  ;;  %v1072_v3 = vsel %vm1066_vm1, %v1061_v32, %v844_v8 }
 0x19a   : > { %3225 = vmatmul.mubr.msk.bf16.gmra.mxu0 %vm1604_vm10, %v2199_v37 }
 0x19b   : > { %3228 = vmatprep.mubr.msk.bf16.mxu0 %vm3505_vm15, %v3504_v18 }
 0x19c   : > { %v1898_v12 = vpop.permute.xlu1 %1897  ;;  %v873_v11 = vpop.permute.xlu0 %872 }
 0x19d   : > { %v1083_v2 = vsel %vm1077_vm2, %v1072_v3, %v873_v11  ;;  %v2131_v1 = vsel %vm1055_vm0, %v4237_v24, %v1898_v12 }
 0x1a0   : > { %v1919_v19 = vpop.permute.xlu1 %1918 }
 0x1a1   : > { %v937_v56 = vpop.permute.xlu0 %936  ;;  %v2141_v23 = vsel %vm1066_vm1, %v2131_v1, %v1919_v19 }
 0x1a2   : > { %v1094_v42 = vsel %vm1088_vm3, %v1083_v2, %v937_v56 }
 0x1a4   : > { %v1948_v31 = vpop.permute.xlu1 %1947 }
 0x1a5   : > { %v959_v52 = vpop.permute.xlu0 %958  ;;  %v2151_v40 = vsel %vm1077_vm2, %v2141_v23, %v1948_v31 }
 0x1a6   : > { %v1105_v59 = vsel %vm1099_vm4, %v1094_v42, %v959_v52 }
 0x1a8   : > { %v2011_v10 = vpop.permute.xlu1 %2010 }
 0x1a9   : > { %v984_v0 = vpop.permute.xlu0 %983  ;;  %v2161_v58 = vsel %vm1088_vm3, %v2151_v40, %v2011_v10 }
 0x1aa   : > { %v1116_v63 = vsel %vm1110_vm5, %v1105_v59, %v984_v0 }
 0x1ac   : > { %v2032_v16 = vpop.permute.xlu1 %2031 }
 0x1ad   : > { %v1028_v33 = vpop.permute.xlu0 %1027  ;;  %v2171_v43 = vsel %vm1099_vm4, %v2161_v58, %v2032_v16 }
 0x1ae   : > { %v1127_v39 = vsel %vm1121_vm6, %v1116_v63, %v1028_v33 }
 0x1b0   : > { %v2057_v14 = vpop.permute.xlu1 %2056 }
 0x1b1   : > { %v1050_v9 = vpop.permute.xlu0 %1049  ;;  %v2181_v24 = vsel %vm1110_vm5, %v2171_v43, %v2057_v14 }
 0x1b2   : > { %v1138_v13 = vsel %vm1132_vm7, %v1127_v39, %v1050_v9 }
 0x1b3   : > { %3199 = vmatmul.mubr.msk.bf16.gmra.mxu1 %vm1604_vm10, %v1138_v13 }
 0x1b4   : > { %v2100_v57 = vpop.permute.xlu1 %2099  ;;  %3202 = vmatprep.mubr.msk.bf16.mxu1 %vm3505_vm15, %v3504_v18 }
 0x1b5   : > { %v824_v6 = vpop.permute.xlu0 %823  ;;  %v2191_v38 = vsel %vm1121_vm6, %v2181_v24, %v2100_v57 }
 0x1b6   : > { %v1063_v7 = vsel %vm1055_vm0, %v4352_v35, %v824_v6 }
 0x1b8   : > { %v2121_v28 = vpop.permute.xlu1 %2120 }
 0x1b9   : > { %v2201_v55 = vsel %vm1132_vm7, %v2191_v38, %v2121_v28  ;;  %v846_v61 = vpop.permute.xlu0 %845 }
 0x1ba   : > { %3229 = vmatmul.mubr.msk.bf16.gmra.mxu0 %vm1604_vm10, %v2201_v55  ;;  %v1074_v45 = vsel %vm1066_vm1, %v1063_v7, %v846_v61 }
 0x1bb   : > { %3232 = vmatprep.mubr.msk.bf16.mxu0 %vm3505_vm15, %v3504_v18 }
 0x1bc   : > { %v1900_v29 = vpop.permute.xlu1 %1899 }
 0x1bd   : > { %v875_v22 = vpop.permute.xlu0 %874  ;;  %v2133_v8 = vsel %vm1055_vm0, %v4376_v53, %v1900_v29 }
 0x1be   : > { %v1085_v27 = vsel %vm1077_vm2, %v1074_v45, %v875_v22 }
 0x1c0   : > { %v1921_v20 = vpop.permute.xlu1 %1920 }
 0x1c1   : > { %v939_v4 = vpop.permute.xlu0 %938  ;;  %v2143_v37 = vsel %vm1066_vm1, %v2133_v8, %v1921_v20  ;;  %v5157_v8 = vld [vmem:[%s5456_s7] ss:$0 sm:$0xff] }
 0x1c2   : > { %v1096_v5 = vsel %vm1088_vm3, %v1085_v27, %v939_v4 }
 0x1c4   : > { %v1950_v46 = vpop.permute.xlu1 %1949 }
 0x1c5   : > { %v961_v34 = vpop.permute.xlu0 %960  ;;  %v2153_v12 = vsel %vm1077_vm2, %v2143_v37, %v1950_v46 }
 0x1c6   : > { %v1107_v50 = vsel %vm1099_vm4, %v1096_v5, %v961_v34 }
 0x1c8   : > { %v2013_v21 = vpop.permute.xlu1 %2012 }
 0x1c9   : > { %v986_v62 = vpop.permute.xlu0 %985  ;;  %v2163_v26 = vsel %vm1088_vm3, %v2153_v12, %v2013_v21 }
 0x1ca   : > { %v1118_v44 = vsel %vm1110_vm5, %v1107_v50, %v986_v62 }
 0x1cc   : > { %v2034_v30 = vpop.permute.xlu1 %2033 }
 0x1cd   : > { %v1030_v41 = vpop.permute.xlu0 %1029  ;;  %v2173_v36 = vsel %vm1099_vm4, %v2163_v26, %v2034_v30 }
 0x1ce   : > { %v1129_v15 = vsel %vm1121_vm6, %v1118_v44, %v1030_v41  ;;  %v3078_v44 = vld [vmem:[%s5455_s6] ss:$0 sm:$0xff] }
 0x1d0   : > { %v2059_v48 = vpop.permute.xlu1 %2058 }
 0x1d1   : > { %v1052_v60 = vpop.permute.xlu0 %1051  ;;  %v2183_v56 = vsel %vm1110_vm5, %v2173_v36, %v2059_v48 }
 0x1d2   : > { %v1140_v35 = vsel %vm1132_vm7, %v1129_v15, %v1052_v60 }
 0x1d3   : > { %3203 = vmatmul.mubr.msk.bf16.gmra.mxu1 %vm1604_vm10, %v1140_v35 }
 0x1d4   : > { %v2102_v11 = vpop.permute.xlu1 %2101  ;;  %3206 = vmatprep.mubr.msk.bf16.mxu1 %vm3505_vm15, %v3504_v18 }
 0x1d5   : > { %v826_v19 = vpop.permute.xlu0 %825  ;;  %v2193_v53 = vsel %vm1121_vm6, %v2183_v56, %v2102_v11 }
 0x1d6   : > { %v1065_v39 = vsel %vm1055_vm0, %v4568_v47, %v826_v19 }
 0x1d8   : > { %v2123_v31 = vpop.permute.xlu1 %2122 }
 0x1d9   : > { %v2203_v52 = vsel %vm1132_vm7, %v2193_v53, %v2123_v31  ;;  %v848_v10 = vpop.permute.xlu0 %847 }
 0x1da   : > { %3233 = vmatmul.mubr.msk.bf16.gmra.mxu0 %vm1604_vm10, %v2203_v52  ;;  %v1076_v1 = vsel %vm1066_vm1, %v1065_v39, %v848_v10 }
 0x1db   : > { %3236 = vmatprep.mubr.msk.bf16.mxu0 %vm3505_vm15, %v3504_v18 }
 0x1dc   : > { %v1902_v0 = vpop.permute.xlu1 %1901 }
 0x1dd   : > { %v877_v32 = vpop.permute.xlu0 %876  ;;  %v2135_v24 = vsel %vm1055_vm0, %v4591_v49, %v1902_v0 }
 0x1de   : > { %v1087_v23 = vsel %vm1077_vm2, %v1076_v1, %v877_v32 }
 0x1e0   : > { %v1923_v3 = vpop.permute.xlu1 %1922 }
 0x1e1   : > { %v941_v16 = vpop.permute.xlu0 %940  ;;  %v2145_v55 = vsel %vm1066_vm1, %v2135_v24, %v1923_v3 }
 0x1e2   : > { %v1098_v58 = vsel %vm1088_vm3, %v1087_v23, %v941_v16  ;;  %v5191_v23 = vld [vmem:[%s5486_s27] ss:$0 sm:$0xff] }
 0x1e4   : > { %v1952_v2 = vpop.permute.xlu1 %1951 }
 0x1e5   : > { %v963_v33 = vpop.permute.xlu0 %962  ;;  %v2155_v22 = vsel %vm1077_vm2, %v2145_v55, %v1952_v2 }
 0x1e6   : > { %v1109_v43 = vsel %vm1099_vm4, %v1098_v58, %v963_v33 }
 0x1e7   : > { %v5102_v42 = vpop.f32.mrf.mxu0 }
 0x1e8   : > { %v2015_v59 = vpop.permute.xlu1 %2014 }
 0x1e9   : > { %v988_v63 = vpop.permute.xlu0 %987  ;;  %v3162_v14 = vpop.f32.mrf.mxu0  ;;  %v2165_v4 = vsel %vm1088_vm3, %v2155_v22, %v2015_v59 }
 0x1ea   : > { %v1120_v47 = vsel %vm1110_vm5, %v1109_v43, %v988_v63 }
 0x1eb   : > { %v5106_v9 = vpop.f32.mrf.mxu0 }
 0x1ec   : > { %v2036_v13 = vpop.permute.xlu1 %2035 }
 0x1ed   : > { %v1032_v40 = vpop.permute.xlu0 %1031  ;;  %v3163_v57 = vpop.f32.mrf.mxu0  ;;  %v2175_v49 = vsel %vm1099_vm4, %v2165_v4, %v2036_v13 }
 0x1ee   : > { %v5111_v6 = vpop.f32.mrf.mxu1  ;;  %v1131_v61 = vsel %vm1121_vm6, %v1120_v47, %v1032_v40 }
 0x1f0   : > { %v2061_v38 = vpop.permute.xlu1 %2060  ;;  %v3174_v28 = vpop.f32.mrf.mxu1 }
 0x1f1   : > { %v1054_v29 = vpop.permute.xlu0 %1053  ;;  %v2185_v46 = vsel %vm1110_vm5, %v2175_v49, %v2061_v38 }
 0x1f2   : > { %v1142_v51 = vsel %vm1132_vm7, %v1131_v61, %v1054_v29  ;;  %v5121_v20 = vpop.f32.mrf.mxu1 }
 0x1f3   : > { %3207 = vmatmul.mubr.msk.bf16.gmra.mxu1 %vm1604_vm10, %v1142_v51 }
 0x1f4   : > { %v3175_v17 = vpop.f32.mrf.mxu1  ;;  %v2125_v54 = vpop.permute.xlu1 %2124  ;;  %3242 = vmatprep.mubr.msk.bf16.mxu1 %vm3505_vm15, %v3504_v18 }
 0x1f5   : > { %v2104_v25 = vpop.permute.xlu0 %2103 }
 0x1f6   : > { %v2195_v34 = vsel %vm1121_vm6, %v2185_v46, %v2104_v25 }
 0x1f7   : > { %v2205_v21 = vsel %vm1132_vm7, %v2195_v34, %v2125_v54 }
 0x1f8   : > { %3237 = vmatmul.mubr.msk.bf16.gmra.mxu0 %vm1604_vm10, %v2205_v21  ;;  %vm5488_vm10 = vmmov %vm5485_vm11 }
 0x1f9   : > { %3264 = vmatprep.mubr.msk.bf16.mxu0 %vm3505_vm15, %v3504_v18 }
 0x1fa   : > { %v5134_v62 = vpop.f32.mrf.mxu0 }
 0x1fc   : > { %v3166_v7 = vpop.f32.mrf.mxu0 }
 0x1fe   : > { %v5136_v45 = vpop.f32.mrf.mxu0 }
 0x200   : > { %v3167_v30 = vpop.f32.mrf.mxu0 }
 0x201   : > { %v5138_v27 = vpop.permute.xlu1 %2374 }
 0x202   : > { %v5140_v41 = vpop.permute.xlu0 %2369  ;;  %v2424_v58 = vmul.f32 %v3078_v44, %v5138_v27 }
 0x203   : > { %v2423_v14 = vmul.f32 %v3078_v44, %v5140_v41 }
 0x204   : > { %v5210_v29 = vadd.f32 %v5157_v8, %v2424_v58 }
 0x205   : > { %v5142_v5 = vpop.permute.xlu1 %2379  ;;  %v5194_v57 = vadd.f32 %v5157_v8, %v2423_v14 }
 0x206   : > { %v5144_v50 = vpop.permute.xlu0 %2384  ;;  %v2425_v7 = vmul.f32 %v3078_v44, %v5142_v5 }
 0x209   : > { %v5149_v48 = vpop.permute.xlu1 %2389 }
 0x20a   : > { %v2427_v15 = vmul.f32 %v3078_v44, %v5149_v48  ;;  %v5152_v60 = vpop.permute.xlu0 %2394 }
 0x20b   : > { %v2428_v35 = vmul.f32 %v3078_v44, %v5152_v60 }
 0x20c   : > { %v5161_v37 = vadd.f32 %v5157_v8, %v2427_v15 }
 0x20d   : > { %v5164_v12 = vadd.f32 %v5157_v8, %v2428_v35  ;;  %v5172_v53 = vpop.permute.xlu1 %2399 }
 0x20e   : > { %v2429_v31 = vmul.f32 %v3078_v44, %v5172_v53  ;;  %v5180_v3 = vpop.permute.xlu0 %2404 }
 0x20f   : > { %v2430_v16 = vmul.f32 %v3078_v44, %v5180_v3 }
 0x210   : > { %v5176_v10 = vadd.f32 %v5157_v8, %v2429_v31  ;;  %v2426_v31 = vmul.f32 %v3078_v44, %v5144_v50 }
 0x211   : > { %v5184_v2 = vadd.f32 %v5157_v8, %v2430_v16  ;;  %v5197_v43 = vpop.permute.xlu1 %2409 }
 0x212   : > { %v5166_v11 = vpop.f32.mrf.mxu1  ;;  %v2431_v47 = vmul.f32 %v3078_v44, %v5197_v43  ;;  %v5215_v49 = vpop.permute.xlu0 %2414 }
 0x214   : > { %v3178_v26 = vpop.f32.mrf.mxu1  ;;  %v5205_v55 = vadd.f32 %v5157_v8, %v2431_v47 }
 0x215   : > { %v5231_v26 = vadd.f32 %v5157_v8, %v2425_v7 }
 0x216   : > { %v5168_v19 = vpop.f32.mrf.mxu1 }
 0x218   : > { %v3179_v36 = vpop.f32.mrf.mxu1 }
 0x21a   : > { %v5170_v56 = vpop.f32.mrf.mxu0 }
 0x21c   : > { %v3170_v52 = vpop.f32.mrf.mxu0 }
 0x21e   : > { %v5178_v0 = vpop.f32.mrf.mxu0 }
 0x220   : > { %v3171_v32 = vpop.f32.mrf.mxu0 }
 0x232   : > { %v1766_v33 = vpop.f32.mrf.mxu1 }
 0x233   : > { %v1767_v1 = vadd.f32 %v1766_v33, %v5102_v42 }
 0x234   : > { %v3192_v59 = vpop.f32.mrf.mxu1 }
 0x236   : > { %v1769_v63 = vpop.f32.mrf.mxu1 }
 0x237   : > { %v1770_v38 = vadd.f32 %v1769_v63, %v5106_v9  ;;  %v2432_v9 = vmul.f32 %v3078_v44, %v5215_v49 }
 0x238   : > { %v3193_v39 = vpop.f32.mrf.mxu1 }
 0x239   : > { %v5223_v46 = vadd.f32 %v5157_v8, %v2432_v9 }
 0x23a   : > { %v2290_v13 = vpop.f32.mrf.mxu0 }
 0x23b   : > { %v2329_v40 = vadd.f32 %v2290_v13, %v1767_v1 }
 0x23c   : > { %v3222_v24 = vpop.f32.mrf.mxu0 }
 0x23d   : > { %v5202_v42 = vadd.f32 %v5191_v23, %v2329_v40 }
 0x23e   : > { %v2293_v28 = vpop.f32.mrf.mxu0 }
 0x23f   : > { %v2755_v61 = vsub.f32 %v5202_v42, %v5194_v57  ;;  %v2330_v22 = vadd.f32 %v2293_v28, %v1770_v38 }
 0x240   : > { %v3223_v51 = vpop.f32.mrf.mxu0 }
 0x241   : > { %v5213_v4 = vadd.f32 %v5191_v23, %v2330_v22 }
 0x243   : > { %v2450_v17 = vpack.c.bf16 %v5213_v4, %v5202_v42  ;;  %v2756_v54 = vsub.f32 %v5213_v4, %v5210_v29 }
 0x245   : > { %3243 = vmatmul.mubr.msk.bf16.vlgmr.msra.gmra.mxu1 %vm1055_vm0, %v2450_v17 }
 0x246   : > { %3246 = vmatprep.mubr.msk.bf16.mxu1 %vm3505_vm15, %v3504_v18 }
 0x252   : > { %v1774_v25 = vpop.f32.mrf.mxu1 }
 0x253   : > { %v1775_v15 = vadd.f32 %v1774_v25, %v5134_v62  ;;  %v5241_v62 = vadd.f32 %v5157_v8, %v2426_v31 }
 0x254   : > { %v3196_v34 = vpop.f32.mrf.mxu1 }
 0x256   : > { %v1777_v21 = vpop.f32.mrf.mxu1 }
 0x257   : > { %v1778_v32 = vadd.f32 %v1777_v21, %v5136_v45 }
 0x258   : > { %v3197_v30 = vpop.f32.mrf.mxu1 }
 0x25a   : > { %v2298_v35 = vpop.f32.mrf.mxu0 }
 0x25b   : > { %v2331_v36 = vadd.f32 %v2298_v35, %v1775_v15 }
 0x25c   : > { %v3226_v52 = vpop.f32.mrf.mxu0 }
 0x25d   : > { %v5236_v16 = vadd.f32 %v5191_v23, %v2331_v36 }
 0x25e   : > { %v2301_v33 = vpop.f32.mrf.mxu0 }
 0x25f   : > { %v2757_v59 = vsub.f32 %v5236_v16, %v5231_v26  ;;  %v2332_v63 = vadd.f32 %v2301_v33, %v1778_v32 }
 0x260   : > { %v3227_v14 = vpop.f32.mrf.mxu0 }
 0x261   : > { %v5244_v39 = vadd.f32 %v5191_v23, %v2332_v63 }
 0x263   : > { %v2451_v44 = vpack.c.bf16 %v5244_v39, %v5236_v16  ;;  %v2758_v45 = vsub.f32 %v5244_v39, %v5241_v62 }
 0x265   : > { %3247 = vmatmul.mubr.msk.bf16.gmra.mxu1 %vm1055_vm0, %v2451_v44 }
 0x266   : > { %3250 = vmatprep.mubr.msk.bf16.mxu1 %vm3505_vm15, %v3504_v18 }
 0x273   : > { %v1782_v1 = vpop.f32.mrf.mxu1 }
 0x274   : > { %v1783_v8 = vadd.f32 %v1782_v1, %v5170_v56 }
 0x275   : > { %v3200_v13 = vpop.f32.mrf.mxu1 }
 0x277   : > { %v1785_v40 = vpop.f32.mrf.mxu1 }
 0x278   : > { %v1786_v28 = vadd.f32 %v1785_v40, %v5178_v0  ;;  %v2596_v0 = vld [vmem:[%s5487_s17] sm:$0xf] }
 0x279   : > { %v3201_v58 = vpop.f32.mrf.mxu1  ;;  %v2620_v7 = vsel %vm5488_vm10, %v2596_v0, 0 }
 0x27a   : > { %v2306_v24 = vpop.f32.mrf.mxu0  ;;  %3263 = vmatpush3.bf16.msra.mxu0 %v2620_v7 }
 0x27b   : > { %v2333_v47 = vadd.f32 %v2306_v24, %v1783_v8 }
 0x27c   : > { %v3230_v38 = vpop.f32.mrf.mxu0 }
 0x27d   : > { %v5256_v22 = vadd.f32 %v5191_v23, %v2333_v47 }
 0x27e   : > { %v2309_v51 = vpop.f32.mrf.mxu0 }
 0x27f   : > { %v2759_v9 = vsub.f32 %v5256_v22, %v5161_v37  ;;  %v2334_v17 = vadd.f32 %v2309_v51, %v1786_v28 }
 0x280   : > { %v3231_v25 = vpop.f32.mrf.mxu0 }
 0x281   : > { %v5261_v34 = vadd.f32 %v5191_v23, %v2334_v17 }
 0x283   : > { %v2452_v56 = vpack.c.bf16 %v5261_v34, %v5256_v22  ;;  %v2760_v21 = vsub.f32 %v5261_v34, %v5164_v12 }
 0x285   : > { %3251 = vmatmul.mubr.msk.bf16.gmra.mxu1 %vm1055_vm0, %v2452_v56 }
 0x286   : > { %3254 = vmatprep.mubr.msk.bf16.mxu1 %vm3505_vm15, %v3504_v18 }
 0x293   : > { %v1790_v30 = vpop.f32.mrf.mxu1 }
 0x294   : > { %v1791_v36 = vadd.f32 %v1790_v30, %v5111_v6 }
 0x295   : > { %v3204_v15 = vpop.f32.mrf.mxu1 }
 0x297   : > { %v1793_v35 = vpop.f32.mrf.mxu1 }
 0x298   : > { %v1794_v63 = vadd.f32 %v1793_v35, %v5121_v20 }
 0x299   : > { %v3205_v31 = vpop.f32.mrf.mxu1 }
 0x29a   : > { %v2314_v52 = vpop.f32.mrf.mxu0 }
 0x29b   : > { %v2335_v32 = vadd.f32 %v2314_v52, %v1791_v36 }
 0x29c   : > { %v3234_v33 = vpop.f32.mrf.mxu0 }
 0x29d   : > { %v5277_v14 = vadd.f32 %v5191_v23, %v2335_v32 }
 0x29e   : > { %v2317_v44 = vpop.f32.mrf.mxu0 }
 0x29f   : > { %v2761_v1 = vsub.f32 %v5277_v14, %v5176_v10  ;;  %v2336_v13 = vadd.f32 %v2317_v44, %v1794_v63  ;;  %v5318_v63 = vld [vmem:[%s5490_s18] ss:$0 sm:$0xff] }
 0x2a0   : > { %v3235_v40 = vpop.f32.mrf.mxu0 }
 0x2a1   : > { %v5282_v8 = vadd.f32 %v5191_v23, %v2336_v13 }
 0x2a3   : > { %v2453_v6 = vpack.c.bf16 %v5282_v8, %v5277_v14  ;;  %v2762_v58 = vsub.f32 %v5282_v8, %v5184_v2 }
 0x2a5   : > { %3255 = vmatmul.mubr.msk.bf16.gmra.mxu1 %vm1055_vm0, %v2453_v6 }
 0x2a6   : > { %3258 = vmatprep.mubr.msk.bf16.mxu1 %vm3505_vm15, %v3504_v18 }
 0x2b3   : > { %v1798_v20 = vpop.f32.mrf.mxu1 }
 0x2b4   : > { %v1799_v47 = vadd.f32 %v1798_v20, %v5166_v11 }
 0x2b5   : > { %v3208_v24 = vpop.f32.mrf.mxu1 }
 0x2b7   : > { %v1801_v38 = vpop.f32.mrf.mxu1 }
 0x2b8   : > { %v2322_v28 = vpop.f32.mrf.mxu0  ;;  %v1802_v56 = vadd.f32 %v1801_v38, %v5168_v19  ;;  %v5309_v19 = vld [vmem:[%s5489_s30] ss:$0 sm:$0xff] }
 0x2b9   : > { %v2337_v51 = vadd.f32 %v2322_v28, %v1799_v47  ;;  %v3209_v17 = vpop.f32.mrf.mxu1  ;;  %v2463_v52 = vmul.f32 %v5309_v19, %v5140_v41 }
 0x2ba   : > { %v3238_v25 = vpop.f32.mrf.mxu0 }
 0x2bb   : > { %v5294_v0 = vadd.f32 %v5191_v23, %v2337_v51  ;;  %v2466_v51 = vmul.f32 %v5309_v19, %v5144_v50 }
 0x2bc   : > { %v2325_v7 = vpop.f32.mrf.mxu0 }
 0x2bd   : > { %v2763_v30 = vsub.f32 %v5294_v0, %v5205_v55  ;;  %v2338_v15 = vadd.f32 %v2325_v7, %v1802_v56 }
 0x2be   : > { %v3239_v35 = vpop.f32.mrf.mxu0 }
 0x2bf   : > { %v5299_v36 = vadd.f32 %v5191_v23, %v2338_v15  ;;  %v2464_v23 = vmul.f32 %v5309_v19, %v5138_v27  ;;  %v2465_v27 = vmul.f32 %v5309_v19, %v5142_v5  ;;  %v2467_v5 = vmul.f32 %v5309_v19, %v5149_v48 }
 0x2c0   : > { %v2469_v48 = vmul.f32 %v5309_v19, %v5172_v53  ;;  %v2471_v53 = vmul.f32 %v5309_v19, %v5197_v43 }
 0x2c1   : > { %v2454_v11 = vpack.c.bf16 %v5299_v36, %v5294_v0  ;;  %v2764_v31 = vsub.f32 %v5299_v36, %v5223_v46 }
 0x2c3   : > { %3259 = vmatmul.mubr.msk.bf16.gmra.mxu1 %vm1055_vm0, %v2454_v11 }
 0x305   : > { %v2525_v32 = vpop.f32.mrf.mxu1 }
 0x306   : > { %v2526_v33 = vadd.f32 %v2525_v32, %v2463_v52 }
 0x307   : > { %v3244_v44 = vpop.f32.mrf.mxu1 }
 0x308   : > { %v2571_v40 = vadd.f32 %v5318_v63, %v2526_v33  ;;  %v2468_v33 = vmul.f32 %v5309_v19, %v5152_v60 }
 0x309   : > { %v2528_v13 = vpop.f32.mrf.mxu1 }
 0x30a   : > { %v2529_v6 = vadd.f32 %v2528_v13, %v2464_v23  ;;  %v2581_v47 = vmax.f32 %v2571_v40, 0.0 }
 0x30b   : > { %v3245_v20 = vpop.f32.mrf.mxu1 }
 0x30c   : > { %v2572_v24 = vadd.f32 %v5318_v63, %v2529_v6 }
 0x30e   : > { %v2582_v41 = vmax.f32 %v2572_v24, 0.0 }
 0x310   : > { %v2591_v38 = vpack.c.bf16 %v2582_v41, %v2581_v47 }
 0x312   : > { %3265 = vmatmul.mubr.msk.bf16.vlgmr.msra.gmra.mxu0 %vm1055_vm0, %v2591_v38 }
 0x313   : > { %3268 = vmatprep.mubr.msk.bf16.mxu0 %vm3505_vm15, %v3504_v18 }
 0x325   : > { %v2533_v28 = vpop.f32.mrf.mxu1 }
 0x326   : > { %v2534_v17 = vadd.f32 %v2533_v28, %v2465_v27 }
 0x327   : > { %v3248_v25 = vpop.f32.mrf.mxu1 }
 0x328   : > { %v2573_v7 = vadd.f32 %v5318_v63, %v2534_v17  ;;  %v2470_v17 = vmul.f32 %v5309_v19, %v5180_v3 }
 0x329   : > { %v2536_v56 = vpop.f32.mrf.mxu1 }
 0x32a   : > { %v2537_v15 = vadd.f32 %v2536_v56, %v2466_v51  ;;  %v2583_v52 = vmax.f32 %v2573_v7, 0.0 }
 0x32b   : > { %v3249_v35 = vpop.f32.mrf.mxu1 }
 0x32c   : > { %v2574_v11 = vadd.f32 %v5318_v63, %v2537_v15 }
 0x32e   : > { %v2584_v32 = vmax.f32 %v2574_v11, 0.0 }
 0x330   : > { %v2592_v23 = vpack.c.bf16 %v2584_v32, %v2583_v52 }
 0x332   : > { %3269 = vmatmul.mubr.msk.bf16.gmra.mxu0 %vm1055_vm0, %v2592_v23 }
 0x333   : > { %3272 = vmatprep.mubr.msk.bf16.mxu0 %vm3505_vm15, %v3504_v18 }
 0x345   : > { %v2541_v50 = vpop.f32.mrf.mxu1 }
 0x346   : > { %v2542_v44 = vadd.f32 %v2541_v50, %v2467_v5  ;;  %v2472_v50 = vmul.f32 %v5309_v19, %v5215_v49 }
 0x347   : > { %v3252_v13 = vpop.f32.mrf.mxu1 }
 0x348   : > { %v2575_v6 = vadd.f32 %v5318_v63, %v2542_v44 }
 0x349   : > { %v2544_v40 = vpop.f32.mrf.mxu1 }
 0x34a   : > { %v2545_v20 = vadd.f32 %v2544_v40, %v2468_v33  ;;  %v2585_v41 = vmax.f32 %v2575_v6, 0.0 }
 0x34b   : > { %v3253_v24 = vpop.f32.mrf.mxu1 }
 0x34c   : > { %v2576_v47 = vadd.f32 %v5318_v63, %v2545_v20 }
 0x34e   : > { %v2586_v38 = vmax.f32 %v2576_v47, 0.0 }
 0x350   : > { %v2593_v27 = vpack.c.bf16 %v2586_v38, %v2585_v41 }
 0x352   : > { %3273 = vmatmul.mubr.msk.bf16.gmra.mxu0 %vm1055_vm0, %v2593_v27 }
 0x353   : > { %3276 = vmatprep.mubr.msk.bf16.mxu0 %vm3505_vm15, %v3504_v18 }
 0x365   : > { %v2549_v60 = vpop.f32.mrf.mxu1 }
 0x366   : > { %v2550_v28 = vadd.f32 %v2549_v60, %v2469_v48 }
 0x367   : > { %v3256_v51 = vpop.f32.mrf.mxu1 }
 0x368   : > { %v2577_v56 = vadd.f32 %v5318_v63, %v2550_v28 }
 0x369   : > { %v2552_v25 = vpop.f32.mrf.mxu1 }
 0x36a   : > { %v2553_v7 = vadd.f32 %v2552_v25, %v2470_v17  ;;  %v2587_v11 = vmax.f32 %v2577_v56, 0.0 }
 0x36b   : > { %v3257_v15 = vpop.f32.mrf.mxu1 }
 0x36c   : > { %v2578_v35 = vadd.f32 %v5318_v63, %v2553_v7 }
 0x36e   : > { %v2588_v52 = vmax.f32 %v2578_v35, 0.0 }
 0x370   : > { %v2594_v32 = vpack.c.bf16 %v2588_v52, %v2587_v11 }
 0x372   : > { %3277 = vmatmul.mubr.msk.bf16.gmra.mxu0 %vm1055_vm0, %v2594_v32 }
 0x373   : > { %3280 = vmatprep.mubr.msk.bf16.mxu0 %vm3505_vm15, %v3504_v18  ;;  %v5362_v18 = vld [vmem:[%s5491_s16] ss:$0 sm:$0xff] }
 0x383   : > { %v2557_v23 = vpop.f32.mrf.mxu1 }
 0x384   : > { %v2558_v3 = vadd.f32 %v2557_v23, %v2471_v53 }
 0x385   : > { %v3260_v5 = vpop.f32.mrf.mxu1 }
 0x386   : > { %v2579_v44 = vadd.f32 %v5318_v63, %v2558_v3 }
 0x387   : > { %v2560_v33 = vpop.f32.mrf.mxu1 }
 0x388   : > { %v2561_v13 = vadd.f32 %v2560_v33, %v2472_v50  ;;  %v2589_v20 = vmax.f32 %v2579_v44, 0.0 }
 0x389   : > { %v3261_v40 = vpop.f32.mrf.mxu1 }
 0x38a   : > { %v2580_v6 = vadd.f32 %v5318_v63, %v2561_v13 }
 0x38c   : > { %v2590_v24 = vmax.f32 %v2580_v6, 0.0 }
 0x38e   : > { %v2595_v47 = vpack.c.bf16 %v2590_v24, %v2589_v20 }
 0x390   : > { %3281 = vmatmul.mubr.msk.bf16.gmra.mxu0 %vm1055_vm0, %v2595_v47 }
 0x3d2   : > { %v2656_v43 = vpop.f32.mrf.mxu0 }
 0x3d3   : > { %v2657_v49 = vadd.f32 %v5362_v18, %v2656_v43 }
 0x3d4   : > { %v3266_v19 = vpop.f32.mrf.mxu0 }
 0x3d5   : > { %v3093_v41 = vmul.f32 -1.442695, %v2657_v49 }
 0x3d6   : > { %v2659_v38 = vpop.f32.mrf.mxu0 }
 0x3d7   : > { %3416 = vpow2.f32 %v3093_v41  ;;  %v2660_v27 = vadd.f32 %v5362_v18, %v2659_v38 }
 0x3d8   : > { %v3267_v63 = vpop.f32.mrf.mxu0 }
 0x3d9   : > { %v3094_v48 = vmul.f32 -1.442695, %v2660_v27 }
 0x3db   : > { %3418 = vpow2.f32 %v3094_v48 }
 0x3e4   : > { %v3417_v60 = vpop.eup %3416 }
 0x3e5   : > { %v2725_v28 = vadd.f32 1.0, %v3417_v60 }
 0x3e7   : > { %3420 = vrcp.f32 %v2725_v28 }
 0x3e8   : > { %v3419_v51 = vpop.eup %3418 }
 0x3e9   : > { %v2726_v17 = vadd.f32 1.0, %v3419_v51 }
 0x3eb   : > { %3422 = vrcp.f32 %v2726_v17 }
 0x3f2   : > { %v2664_v25 = vpop.f32.mrf.mxu0 }
 0x3f3   : > { %v2665_v56 = vadd.f32 %v5362_v18, %v2664_v25 }
 0x3f4   : > { %v3421_v7 = vpop.eup %3420  ;;  %v3270_v15 = vpop.f32.mrf.mxu0 }
 0x3f5   : > { %v2765_v35 = vmul.f32 %v3421_v7, %v2755_v61  ;;  %v3095_v11 = vmul.f32 -1.442695, %v2665_v56 }
 0x3f6   : > { %v2667_v52 = vpop.f32.mrf.mxu0 }
 0x3f7   : > { %v2775_v32 = vadd.f32 %v2765_v35, %v5194_v57  ;;  %3424 = vpow2.f32 %v3095_v11  ;;  %v2668_v53 = vadd.f32 %v5362_v18, %v2667_v52 }
 0x3f8   : > { %v3423_v23 = vpop.eup %3422  ;;  %v3271_v3 = vpop.f32.mrf.mxu0 }
 0x3f9   : > { %2785 = vst.msk [vmem:[%s3639_s23] sm:$0xff] %vm1055_vm0, %v2775_v32  ;;  %v2766_v5 = vmul.f32 %v3423_v23, %v2756_v54  ;;  %v3096_v50 = vmul.f32 -1.442695, %v2668_v53 }
 0x3fb   : > { %v2776_v33 = vadd.f32 %v2766_v5, %v5210_v29  ;;  %3426 = vpow2.f32 %v3096_v50 }
 0x3fd   : > { %2786 = vst.msk [vmem:[%s3639_s23 + $0x8] sm:$0xff] %vm1055_vm0, %v2776_v33 }
 0x404   : > { %v3425_v42 = vpop.eup %3424 }
 0x405   : > { %v2727_v61 = vadd.f32 1.0, %v3425_v42 }
 0x407   : > { %3428 = vrcp.f32 %v2727_v61 }
 0x408   : > { %v3427_v57 = vpop.eup %3426 }
 0x409   : > { %v2728_v44 = vadd.f32 1.0, %v3427_v57 }
 0x40b   : > { %3430 = vrcp.f32 %v2728_v44 }
 0x412   : > { %v2672_v13 = vpop.f32.mrf.mxu0 }
 0x413   : > { %v2673_v40 = vadd.f32 %v5362_v18, %v2672_v13 }
 0x414   : > { %v3429_v6 = vpop.eup %3428  ;;  %v3274_v4 = vpop.f32.mrf.mxu0 }
 0x415   : > { %v2767_v29 = vmul.f32 %v3429_v6, %v2757_v59  ;;  %v3097_v54 = vmul.f32 -1.442695, %v2673_v40 }
 0x416   : > { %v2675_v20 = vpop.f32.mrf.mxu0 }
 0x417   : > { %v2777_v24 = vadd.f32 %v2767_v29, %v5231_v26  ;;  %3432 = vpow2.f32 %v3097_v54  ;;  %v2676_v47 = vadd.f32 %v5362_v18, %v2675_v20 }
 0x418   : > { %v3431_v43 = vpop.eup %3430  ;;  %v3275_v49 = vpop.f32.mrf.mxu0 }
 0x419   : > { %2787 = vst.msk [vmem:[%s3639_s23 + $0x10] sm:$0xff] %vm1055_vm0, %v2777_v24  ;;  %v2768_v19 = vmul.f32 %v3431_v43, %v2758_v45  ;;  %v3098_v41 = vmul.f32 -1.442695, %v2676_v47 }
 0x41b   : > { %v2778_v38 = vadd.f32 %v2768_v19, %v5241_v62  ;;  %3434 = vpow2.f32 %v3098_v41 }
 0x41d   : > { %2788 = vst.msk [vmem:[%s3639_s23 + $0x18] sm:$0xff] %vm1055_vm0, %v2778_v38 }
 0x424   : > { %v3433_v16 = vpop.eup %3432 }
 0x425   : > { %v2729_v59 = vadd.f32 1.0, %v3433_v16 }
 0x427   : > { %3436 = vrcp.f32 %v2729_v59 }
 0x428   : > { %v3435_v26 = vpop.eup %3434 }
 0x429   : > { %v2730_v27 = vadd.f32 1.0, %v3435_v26 }
 0x42b   : > { %3438 = vrcp.f32 %v2730_v27 }
 0x432   : > { %v2680_v63 = vpop.f32.mrf.mxu0 }
 0x433   : > { %v2681_v48 = vadd.f32 %v5362_v18, %v2680_v63 }
 0x434   : > { %v3437_v60 = vpop.eup %3436  ;;  %v3278_v39 = vpop.f32.mrf.mxu0 }
 0x435   : > { %v2769_v62 = vmul.f32 %v3437_v60, %v2759_v9  ;;  %v3099_v45 = vmul.f32 -1.442695, %v2681_v48 }
 0x436   : > { %v2683_v28 = vpop.f32.mrf.mxu0 }
 0x437   : > { %v2779_v51 = vadd.f32 %v2769_v62, %v5161_v37  ;;  %3440 = vpow2.f32 %v3099_v45  ;;  %v2684_v17 = vadd.f32 %v5362_v18, %v2683_v28 }
 0x438   : > { %v3439_v25 = vpop.eup %3438  ;;  %v3279_v56 = vpop.f32.mrf.mxu0 }
 0x439   : > { %2789 = vst.msk [vmem:[%s3639_s23 + $0x20] sm:$0xff] %vm1055_vm0, %v2779_v51  ;;  %v2770_v7 = vmul.f32 %v3439_v25, %v2760_v21  ;;  %v3100_v15 = vmul.f32 -1.442695, %v2684_v17 }
 0x43b   : > { %v2780_v35 = vadd.f32 %v2770_v7, %v5164_v12  ;;  %3442 = vpow2.f32 %v3100_v15 }
 0x43d   : > { %2790 = vst.msk [vmem:[%s3639_s23 + $0x28] sm:$0xff] %vm1055_vm0, %v2780_v35 }
 0x444   : > { %v3441_v22 = vpop.eup %3440 }
 0x445   : > { %v2731_v9 = vadd.f32 1.0, %v3441_v22 }
 0x447   : > { %3444 = vrcp.f32 %v2731_v9 }
 0x448   : > { %v3443_v37 = vpop.eup %3442 }
 0x449   : > { %v2732_v11 = vadd.f32 1.0, %v3443_v37 }
 0x44b   : > { %3446 = vrcp.f32 %v2732_v11 }
 0x450   : > { %v2688_v52 = vpop.f32.mrf.mxu0 }
 0x451   : > { %v2689_v32 = vadd.f32 %v5362_v18, %v2688_v52 }
 0x452   : > { %v3282_v53 = vpop.f32.mrf.mxu0 }
 0x453   : > { %v3101_v34 = vmul.f32 -1.442695, %v2689_v32 }
 0x454   : > { %v3445_v21 = vpop.eup %3444  ;;  %v2691_v23 = vpop.f32.mrf.mxu0 }
 0x455   : > { %v2771_v12 = vmul.f32 %v3445_v21, %v2761_v1  ;;  %3448 = vpow2.f32 %v3101_v34  ;;  %v2692_v3 = vadd.f32 %v5362_v18, %v2691_v23 }
 0x456   : > { %v3283_v5 = vpop.f32.mrf.mxu0 }
 0x457   : > { %v2781_v50 = vadd.f32 %v2771_v12, %v5176_v10  ;;  %v3102_v33 = vmul.f32 -1.442695, %v2692_v3 }
 0x458   : > { %v3447_v42 = vpop.eup %3446 }
 0x459   : > { %2791 = vst.msk [vmem:[%s3639_s23 + $0x30] sm:$0xff] %vm1055_vm0, %v2781_v50  ;;  %v2772_v61 = vmul.f32 %v3447_v42, %v2762_v58  ;;  %3450 = vpow2.f32 %v3102_v33 }
 0x45b   : > { %v2782_v14 = vadd.f32 %v2772_v61, %v5184_v2 }
 0x45d   : > { %2792 = vst.msk [vmem:[%s3639_s23 + $0x38] sm:$0xff] %vm1055_vm0, %v2782_v14 }
 0x462   : > { %v3449_v1 = vpop.eup %3448 }
 0x463   : > { %v2733_v18 = vadd.f32 1.0, %v3449_v1 }
 0x465   : > { %3452 = vrcp.f32 %v2733_v18 }
 0x466   : > { %v3451_v57 = vpop.eup %3450 }
 0x467   : > { %v2734_v10 = vadd.f32 1.0, %v3451_v57 }
 0x469   : > { %3454 = vrcp.f32 %v2734_v10 }
 0x472   : > { %v3453_v44 = vpop.eup %3452 }
 0x473   : > { %v2773_v13 = vmul.f32 %v3453_v44, %v2763_v30 }
 0x475   : > { %v2783_v8 = vadd.f32 %v2773_v13, %v5205_v55 }
 0x476   : > { %v3455_v58 = vpop.eup %3454 }
 0x477   : > { %2793 = vst.msk [vmem:[%s3639_s23 + $0x40] sm:$0xff] %vm1055_vm0, %v2783_v8  ;;  %v2774_v2 = vmul.f32 %v3455_v58, %v2764_v31 }
 0x479   : > { %v2784_v40 = vadd.f32 %v2774_v2, %v5223_v46 }
 0x47b   : > { %2794 = vst.msk [vmem:[%s3639_s23 + $0x48] sm:$0xff] %vm1055_vm0, %v2784_v40 }
 0x47c PF: > { %s5492_s20 = sld [smem:[#allocation5_spill]] }
 0x47d   : > { %s5493_s25 = sld [smem:[#allocation3_spill]] }
 0x47e   : > { %s5494_s26 = sld [smem:[#allocation4_spill]] }
 0x47f   : > { %s5495_s27 = sld [smem:[#allocation6_spill]] }
 0x480   : > { %s5496_s28 = sld [smem:[#allocation7_spill]] }
 0x482   : > { %s23_s29 = sadd.s32 1, %s5492_s20  }
 0x483   : > { %p20_p4 = scmp.ge.s32.totalorder %s23_s29, 10  }
 0x485   :  { %22 = sbr.rel (!%p20_p4) target bundleno = 7 (0x7), region = 135 }

</bundles_post_ra>
